<compile_context>
chip_gen: v7x
topology: tpu7x:2x2x1
jax: 0.10.0
libtpu: 0.0.40
codegen_flags: <defaults>
</compile_context>

<pallas_src>
import jax
import jax.numpy as jnp
from jax import lax
from jax.experimental import pallas as pl
from jax.experimental.pallas import tpu as pltpu

_D = 3
_N_POINTS = 1024


def _emd_kernel(p_ref, t_ref, out_ref):
    # p_ref/t_ref blocks: (Bt, 3*N) f32; rows are batches, lanes interleave x,y,z.
    p = p_ref[...]
    t = t_ref[...]
    bt, c = p.shape
    n = c // _D
    nf = jnp.float32(n)

    # Coordinate-id field 0,1,2,0,1,2,... along lanes.  Built with float ops
    # (mul/floor/sub) so no vector integer div/mod lowering is required; the
    # values are exact small integers, so equality selects are exact.
    lane = lax.broadcasted_iota(jnp.int32, (bt, c), 1).astype(jnp.float32)
    cid = lane - 3.0 * jnp.floor(lane * (1.0 / 3.0))
    masks = [jnp.where(cid == jnp.float32(k), 1.0, 0.0).astype(jnp.float32)
             for k in range(_D)]

    # Shared per-batch centroid (mean of pred).  Subtracting the SAME vector from
    # both clouds leaves every p_i - t_j unchanged but removes the common offset
    # that would otherwise cancel catastrophically in the closed form.
    cen = [jnp.sum(p * m, axis=-1, keepdims=True) / nf for m in masks]   # 3x(Bt,1)
    cen_field = cen[0] * masks[0] + cen[1] * masks[1] + cen[2] * masks[2]

    pc = p - cen_field
    tc = t - cen_field

    sum_sq = (jnp.sum(pc * pc, axis=-1, keepdims=True)
              + jnp.sum(tc * tc, axis=-1, keepdims=True))                # (Bt,1)

    cross = jnp.zeros((bt, 1), jnp.float32)
    for m in masks:                                                       # 3 coords
        sp = jnp.sum(pc * m, axis=-1, keepdims=True)
        st = jnp.sum(tc * m, axis=-1, keepdims=True)
        cross = cross + sp * st

    total = nf * sum_sq - 2.0 * cross                                    # (Bt,1)

    # One lane-dense, unmasked store per grid step; wrapper reads lane 0.
    out_ref[...] = jnp.broadcast_to(total, out_ref.shape)


def _pick_block_b(batch):
    # Tiny batches: single step (per-step overhead beats the second core).
    if batch <= 8:
        return batch
    # Otherwise a multiple of 8, >= 2 grid steps (so v7x megacore gets both TCs),
    # capped at 32 so VMEM temporaries stay a few MiB even on v7x's 64 MiB VMEM.
    return int(min(32, max(8, (pl.cdiv(batch, 2) // 8) * 8)))


def emd_loss(pred, target, *, block_b=None):
    assert pred.shape == target.shape
    batch, n, d = pred.shape
    assert n == _N_POINTS and d == _D  # matches the PyTorch module's asserts
    c = n * d

    # (B, N, 3) -> (B, 3N): trivial contiguous reshape, no HBM round trip.
    p = pred.reshape(batch, c).astype(jnp.float32)
    t = target.reshape(batch, c).astype(jnp.float32)
    # TODO(synk): optionally stream inputs as bf16 (halves HBM traffic) once the
    # accuracy budget allows; all accumulation stays f32 inside the kernel.

    bt = _pick_block_b(batch) if block_b is None else int(block_b)
    steps = pl.cdiv(batch, bt)
    bp = steps * bt
    if bp != batch:
        p = jnp.pad(p, ((0, bp - batch), (0, 0)))
        t = jnp.pad(t, ((0, bp - batch), (0, 0)))

    out = pl.pallas_call(
        _emd_kernel,
        out_shape=jax.ShapeDtypeStruct((bp, 128), jnp.float32),
        grid_spec=pltpu.PrefetchScalarGridSpec(
            num_scalar_prefetch=0,
            grid=(steps,),
            in_specs=[
                pl.BlockSpec((bt, c), lambda g: (g, 0)),  # pred rows
                pl.BlockSpec((bt, c), lambda g: (g, 0)),  # target rows
            ],
            out_specs=pl.BlockSpec((bt, 128), lambda g: (g, 0)),
        ),
        compiler_params=pltpu.CompilerParams(
            dimension_semantics=("parallel",)),
    )(p, t)

    per_batch_sum = out[:batch, 0]  # (B,)
    # topk(k=num_points)+scatter(1) => all-ones assignment, so the loss is the
    # full pairwise sum divided by num_points, averaged over the batch.
    return jnp.mean(per_batch_sum / jnp.float32(n))


def _emd_loss_ref(pred, target):
    # Pure-JAX reference of the PyTorch forward (assignment == all ones).
    diff = pred[:, :, None, :] - target[:, None, :, :]
    dist = jnp.sum(diff.astype(jnp.float32) ** 2, axis=-1)
    n = pred.shape[1]
    return jnp.mean(jnp.sum(dist, axis=(1, 2)) / n)


if __name__ == "__main__":
    B, N, D = 2, 1024, 3  # module asserts N == 1024 and D == 3
    key = jax.random.PRNGKey(0)
    k1, k2 = jax.random.split(key)
    pred = jax.random.normal(k1, (B, N, D), dtype=jnp.float32)
    target = jax.random.normal(k2, (B, N, D), dtype=jnp.float32)

    fn = jax.jit(emd_loss)

    out = fn(pred, target)
    jax.block_until_ready(out)
    ref = _emd_loss_ref(pred, target)
    assert jnp.allclose(out, ref, rtol=2e-3, atol=1e-3), (out, ref)

    # Stability check: same clouds with a large shared offset (exercises the
    # shared-centroid subtraction; the true loss is unchanged by the shift).
    off = jnp.array([100.0, -75.0, 50.0], dtype=jnp.float32)
    out2 = fn(pred + off, target + off)
    jax.block_until_ready(out2)
    ref2 = _emd_loss_ref(pred + off, target + off)
    assert jnp.allclose(out2, ref2, rtol=2e-3, atol=1e-3), (out2, ref2)

    print("KERNEL_OK")
</pallas_src>

<mosaic_0001>
module attributes {stable_mosaic.version = 11 : i64} {
  func.func @_emd_kernel(%arg0: i32, %arg1: memref<2x3072xf32, #tpu.memory_space<vmem>>, %arg2: memref<2x3072xf32, #tpu.memory_space<vmem>>, %arg3: memref<2x128xf32, #tpu.memory_space<vmem>>) attributes {dimension_semantics = [#tpu.dimension_semantics<parallel>], iteration_bounds = array<i64: 1>, scalar_prefetch = 0 : i64, scratch_operands = 0 : i64, tpu.core_type = #tpu.core_type<tc>, window_params = [{transform_indices = @transform_0, window_bounds = array<i64: 2, 3072>}, {transform_indices = @transform_1, window_bounds = array<i64: 2, 3072>}, {transform_indices = @transform_2, window_bounds = array<i64: 2, 128>}]} {
    %c0 = arith.constant 0 : index
    %c0_0 = arith.constant 0 : index
    %0 = vector.load %arg1[%c0, %c0_0] : memref<2x3072xf32, #tpu.memory_space<vmem>>, vector<2x3072xf32>
    %c0_1 = arith.constant 0 : index
    %c0_2 = arith.constant 0 : index
    %1 = vector.load %arg2[%c0_1, %c0_2] : memref<2x3072xf32, #tpu.memory_space<vmem>>, vector<2x3072xf32>
    %2 = tpu.iota {dimensions = array<i32: 1>} : vector<2x3072xi32>
    %3 = arith.sitofp %2 : vector<2x3072xi32> to vector<2x3072xf32>
    %cst = arith.constant 0.333333343 : f32
    %4 = vector.broadcast %cst : f32 to vector<2x3072xf32>
    %5 = arith.mulf %3, %4 : vector<2x3072xf32>
    %6 = math.floor %5 : vector<2x3072xf32>
    %cst_3 = arith.constant 3.000000e+00 : f32
    %7 = vector.broadcast %cst_3 : f32 to vector<2x3072xf32>
    %8 = arith.mulf %7, %6 : vector<2x3072xf32>
    %9 = arith.subf %3, %8 : vector<2x3072xf32>
    %cst_4 = arith.constant 0.000000e+00 : f32
    %10 = vector.broadcast %cst_4 : f32 to vector<2x3072xf32>
    %11 = arith.cmpf oeq, %9, %10 : vector<2x3072xf32>
    %cst_5 = arith.constant 1.000000e+00 : f32
    %cst_6 = arith.constant 0.000000e+00 : f32
    %12 = vector.broadcast %cst_5 : f32 to vector<2x3072xf32>
    %13 = vector.broadcast %cst_6 : f32 to vector<2x3072xf32>
    %14 = arith.select %11, %12, %13 : vector<2x3072xi1>, vector<2x3072xf32>
    %cst_7 = arith.constant 1.000000e+00 : f32
    %15 = vector.broadcast %cst_7 : f32 to vector<2x3072xf32>
    %16 = arith.cmpf oeq, %9, %15 : vector<2x3072xf32>
    %cst_8 = arith.constant 1.000000e+00 : f32
    %cst_9 = arith.constant 0.000000e+00 : f32
    %17 = vector.broadcast %cst_8 : f32 to vector<2x3072xf32>
    %18 = vector.broadcast %cst_9 : f32 to vector<2x3072xf32>
    %19 = arith.select %16, %17, %18 : vector<2x3072xi1>, vector<2x3072xf32>
    %cst_10 = arith.constant 2.000000e+00 : f32
    %20 = vector.broadcast %cst_10 : f32 to vector<2x3072xf32>
    %21 = arith.cmpf oeq, %9, %20 : vector<2x3072xf32>
    %cst_11 = arith.constant 1.000000e+00 : f32
    %cst_12 = arith.constant 0.000000e+00 : f32
    %22 = vector.broadcast %cst_11 : f32 to vector<2x3072xf32>
    %23 = vector.broadcast %cst_12 : f32 to vector<2x3072xf32>
    %24 = arith.select %21, %22, %23 : vector<2x3072xi1>, vector<2x3072xf32>
    %25 = arith.mulf %0, %14 : vector<2x3072xf32>
    %cst_13 = arith.constant dense<0.000000e+00> : vector<2xf32>
    %26 = vector.multi_reduction <add>, %25, %cst_13 [1] : vector<2x3072xf32> to vector<2xf32>
    %27 = vector.shape_cast %26 : vector<2xf32> to vector<2x1xf32>
    %cst_14 = arith.constant 1.024000e+03 : f32
    %28 = vector.broadcast %cst_14 : f32 to vector<2x1xf32>
    %29 = arith.divf %27, %28 : vector<2x1xf32>
    %30 = arith.mulf %0, %19 : vector<2x3072xf32>
    %cst_15 = arith.constant dense<0.000000e+00> : vector<2xf32>
    %31 = vector.multi_reduction <add>, %30, %cst_15 [1] : vector<2x3072xf32> to vector<2xf32>
    %32 = vector.shape_cast %31 : vector<2xf32> to vector<2x1xf32>
    %cst_16 = arith.constant 1.024000e+03 : f32
    %33 = vector.broadcast %cst_16 : f32 to vector<2x1xf32>
    %34 = arith.divf %32, %33 : vector<2x1xf32>
    %35 = arith.mulf %0, %24 : vector<2x3072xf32>
    %cst_17 = arith.constant dense<0.000000e+00> : vector<2xf32>
    %36 = vector.multi_reduction <add>, %35, %cst_17 [1] : vector<2x3072xf32> to vector<2xf32>
    %37 = vector.shape_cast %36 : vector<2xf32> to vector<2x1xf32>
    %cst_18 = arith.constant 1.024000e+03 : f32
    %38 = vector.broadcast %cst_18 : f32 to vector<2x1xf32>
    %39 = arith.divf %37, %38 : vector<2x1xf32>
    %40 = vector.broadcast %29 : vector<2x1xf32> to vector<2x3072xf32>
    %41 = arith.mulf %40, %14 : vector<2x3072xf32>
    %42 = vector.broadcast %34 : vector<2x1xf32> to vector<2x3072xf32>
    %43 = arith.mulf %42, %19 : vector<2x3072xf32>
    %44 = arith.addf %41, %43 : vector<2x3072xf32>
    %45 = vector.broadcast %39 : vector<2x1xf32> to vector<2x3072xf32>
    %46 = arith.mulf %45, %24 : vector<2x3072xf32>
    %47 = arith.addf %44, %46 : vector<2x3072xf32>
    %48 = arith.subf %0, %47 : vector<2x3072xf32>
    %49 = arith.subf %1, %47 : vector<2x3072xf32>
    %50 = arith.mulf %48, %48 : vector<2x3072xf32>
    %cst_19 = arith.constant dense<0.000000e+00> : vector<2xf32>
    %51 = vector.multi_reduction <add>, %50, %cst_19 [1] : vector<2x3072xf32> to vector<2xf32>
    %52 = vector.shape_cast %51 : vector<2xf32> to vector<2x1xf32>
    %53 = arith.mulf %49, %49 : vector<2x3072xf32>
    %cst_20 = arith.constant dense<0.000000e+00> : vector<2xf32>
    %54 = vector.multi_reduction <add>, %53, %cst_20 [1] : vector<2x3072xf32> to vector<2xf32>
    %55 = vector.shape_cast %54 : vector<2xf32> to vector<2x1xf32>
    %56 = arith.addf %52, %55 : vector<2x1xf32>
    %cst_21 = arith.constant 0.000000e+00 : f32
    %57 = vector.broadcast %cst_21 : f32 to vector<2x1xf32>
    %58 = arith.mulf %48, %14 : vector<2x3072xf32>
    %cst_22 = arith.constant dense<0.000000e+00> : vector<2xf32>
    %59 = vector.multi_reduction <add>, %58, %cst_22 [1] : vector<2x3072xf32> to vector<2xf32>
    %60 = vector.shape_cast %59 : vector<2xf32> to vector<2x1xf32>
    %61 = arith.mulf %49, %14 : vector<2x3072xf32>
    %cst_23 = arith.constant dense<0.000000e+00> : vector<2xf32>
    %62 = vector.multi_reduction <add>, %61, %cst_23 [1] : vector<2x3072xf32> to vector<2xf32>
    %63 = vector.shape_cast %62 : vector<2xf32> to vector<2x1xf32>
    %64 = arith.mulf %60, %63 : vector<2x1xf32>
    %65 = arith.addf %57, %64 : vector<2x1xf32>
    %66 = arith.mulf %48, %19 : vector<2x3072xf32>
    %cst_24 = arith.constant dense<0.000000e+00> : vector<2xf32>
    %67 = vector.multi_reduction <add>, %66, %cst_24 [1] : vector<2x3072xf32> to vector<2xf32>
    %68 = vector.shape_cast %67 : vector<2xf32> to vector<2x1xf32>
    %69 = arith.mulf %49, %19 : vector<2x3072xf32>
    %cst_25 = arith.constant dense<0.000000e+00> : vector<2xf32>
    %70 = vector.multi_reduction <add>, %69, %cst_25 [1] : vector<2x3072xf32> to vector<2xf32>
    %71 = vector.shape_cast %70 : vector<2xf32> to vector<2x1xf32>
    %72 = arith.mulf %68, %71 : vector<2x1xf32>
    %73 = arith.addf %65, %72 : vector<2x1xf32>
    %74 = arith.mulf %48, %24 : vector<2x3072xf32>
    %cst_26 = arith.constant dense<0.000000e+00> : vector<2xf32>
    %75 = vector.multi_reduction <add>, %74, %cst_26 [1] : vector<2x3072xf32> to vector<2xf32>
    %76 = vector.shape_cast %75 : vector<2xf32> to vector<2x1xf32>
    %77 = arith.mulf %49, %24 : vector<2x3072xf32>
    %cst_27 = arith.constant dense<0.000000e+00> : vector<2xf32>
    %78 = vector.multi_reduction <add>, %77, %cst_27 [1] : vector<2x3072xf32> to vector<2xf32>
    %79 = vector.shape_cast %78 : vector<2xf32> to vector<2x1xf32>
    %80 = arith.mulf %76, %79 : vector<2x1xf32>
    %81 = arith.addf %73, %80 : vector<2x1xf32>
    %cst_28 = arith.constant 1.024000e+03 : f32
    %82 = vector.broadcast %cst_28 : f32 to vector<2x1xf32>
    %83 = arith.mulf %82, %56 : vector<2x1xf32>
    %cst_29 = arith.constant 2.000000e+00 : f32
    %84 = vector.broadcast %cst_29 : f32 to vector<2x1xf32>
    %85 = arith.mulf %84, %81 : vector<2x1xf32>
    %86 = arith.subf %83, %85 : vector<2x1xf32>
    %87 = vector.shape_cast %86 : vector<2x1xf32> to vector<2x1xf32>
    %88 = vector.broadcast %87 : vector<2x1xf32> to vector<2x128xf32>
    %c0_30 = arith.constant 0 : index
    %c0_31 = arith.constant 0 : index
    %89 = vector.load %arg3[%c0_30, %c0_31] : memref<2x128xf32, #tpu.memory_space<vmem>>, vector<2x128xf32>
    tpu.vector_store %arg3[%c0_30, %c0_31], %88 {strides = array<i32>} : memref<2x128xf32, #tpu.memory_space<vmem>>, vector<2x128xf32>,
    return
  }
  func.func @transform_0(%arg0: i32) -> (i32, i32) {
    %c0_i32 = arith.constant 0 : i32
    %c0_i32_0 = arith.constant 0 : i32
    return %arg0, %c0_i32 : i32, i32
  }
  func.func @transform_1(%arg0: i32) -> (i32, i32) {
    %c0_i32 = arith.constant 0 : i32
    %c0_i32_0 = arith.constant 0 : i32
    return %arg0, %c0_i32 : i32, i32
  }
  func.func @transform_2(%arg0: i32) -> (i32, i32) {
    %c0_i32 = arith.constant 0 : i32
    %c0_i32_0 = arith.constant 0 : i32
    return %arg0, %c0_i32 : i32, i32
  }
}

</mosaic_0001>

<bundles_post_ra>
// kernel: emd_loss.1
= control target key start
LH: loop header
LB: loop body
LE: loop exit
PB: predicated region body
PF: predicated region fallthrough
CT: control target
= control target key end

     0   :  { %v23_v0 = vlaneseq  ;;  %v3057_v1 = vmov 1983009808   ;;  %s4626_s0 = inlined_call_operand.vmem [shape: f32[2,3072], index: 0, kind: input, shape index: {}]   ;;  %s4627_s1 = inlined_call_operand.vmem [shape: f32[2,3072], index: 1, kind: input, shape index: {}]   ;;  %s4628_s2 = inlined_call_operand.vmem [shape: f32[2,128], index: 2, kind: output, shape index: {}]  }
   0x1   :  { %v339_v2 = vunpack.c.l.s4 %v3057_v1 }
   0x2   :  { %v3074_v3 = vand.u32 127, %v23_v0  ;;  %v342_v7 = vshrl.u32 %v23_v0, 7 }
   0x3   :  { %v340_v6 = vunpack.c.0.s8 %v339_v2 }
   0x4   :  { %v3077_v4 = vadd.s32 128, %v3074_v3  ;;  %v3080_v5 = vadd.s32 256, %v3074_v3  ;;  %v3083_v8 = vadd.s32 384, %v3074_v3  ;;  %v3086_v9 = vadd.s32 512, %v3074_v3 }
   0x5   :  { %v3089_v10 = vadd.s32 640, %v3074_v3  ;;  %v3092_v11 = vadd.s32 768, %v3074_v3  ;;  %v3095_v12 = vadd.s32 896, %v3074_v3  ;;  %v3098_v13 = vadd.s32 1024, %v3074_v3 }
   0x6   :  { %v3101_v14 = vadd.s32 1152, %v3074_v3  ;;  %v3104_v15 = vadd.s32 1280, %v3074_v3  ;;  %v3107_v16 = vadd.s32 1408, %v3074_v3  ;;  %v3110_v17 = vadd.s32 1536, %v3074_v3 }
   0x7   :  { %v3113_v18 = vadd.s32 1664, %v3074_v3  ;;  %v3116_v19 = vadd.s32 1792, %v3074_v3  ;;  %v3119_v20 = vadd.s32 1920, %v3074_v3  ;;  %v3122_v21 = vadd.s32 2048, %v3074_v3 }
   0x8   :  { %v3125_v22 = vadd.s32 2176, %v3074_v3  ;;  %v3128_v23 = vadd.s32 2304, %v3074_v3  ;;  %v3131_v24 = vadd.s32 2432, %v3074_v3  ;;  %v3134_v25 = vadd.s32 2560, %v3074_v3 }
   0x9   :  { %v3137_v26 = vadd.s32 2688, %v3074_v3  ;;  %v3140_v27 = vadd.s32 2816, %v3074_v3  ;;  %v3143_v28 = vadd.s32 2944, %v3074_v3  ;;  %v4649_v29 = vcvt.s32.f32 %v3074_v3 }
   0xa   :  { %4765 = vst [vmem:[#allocation2_spill] sm:$0xff] %v3134_v25  ;;  %v4647_v30 = vcvt.s32.f32 %v3077_v4  ;;  %v4646_v31 = vcvt.s32.f32 %v3080_v5  ;;  %v4644_v32 = vcvt.s32.f32 %v3083_v8  ;;  %v4643_v33 = vcvt.s32.f32 %v3086_v9 }
   0xb   :  { %4766 = vst [vmem:[#allocation3_spill] sm:$0xff] %v3137_v26  ;;  %4767 = vst [vmem:[#allocation4_spill] sm:$0xff] %v3140_v27  ;;  %v4641_v34 = vcvt.s32.f32 %v3089_v10  ;;  %v4640_v35 = vcvt.s32.f32 %v3092_v11  ;;  %v4629_v36 = vcvt.s32.f32 %v3095_v12  ;;  %v4630_v37 = vcvt.s32.f32 %v3098_v13 }
   0xc   :  { %4768 = vst [vmem:[#allocation5_spill] sm:$0xff] %v3143_v28  ;;  %v4631_v38 = vcvt.s32.f32 %v3101_v14  ;;  %v4632_v39 = vcvt.s32.f32 %v3104_v15  ;;  %v4633_v40 = vcvt.s32.f32 %v3107_v16  ;;  %v4634_v41 = vcvt.s32.f32 %v3110_v17 }
   0xd   :  { %v4635_v42 = vcvt.s32.f32 %v3113_v18  ;;  %v4636_v43 = vcvt.s32.f32 %v3116_v19  ;;  %v4637_v44 = vcvt.s32.f32 %v3119_v20  ;;  %v4638_v45 = vcvt.s32.f32 %v3122_v21 }
   0xe   :  { %v4639_v46 = vcvt.s32.f32 %v3125_v22  ;;  %v4642_v47 = vcvt.s32.f32 %v3128_v23  ;;  %v4645_v48 = vcvt.s32.f32 %v3131_v24  ;;  %v4648_v49 = vcvt.s32.f32 %v3134_v25 }
   0xf   :  { %v4651_v50 = vcvt.s32.f32 %v3137_v26  ;;  %v72_v51 = vmul.f32 0.33333334, %v4649_v29  ;;  %v4654_v52 = vcvt.s32.f32 %v3140_v27  ;;  %v4657_v53 = vcvt.s32.f32 %v3143_v28 }
  0x10   :  { %v73_v54 = vmul.f32 0.33333334, %v4647_v30  ;;  %v74_v55 = vmul.f32 0.33333334, %v4646_v31  ;;  %v75_v56 = vmul.f32 0.33333334, %v4644_v32  ;;  %v3181_v59 = vsub.s32 %v340_v6, %v342_v7 }
  0x11   :  { %v76_v57 = vmul.f32 0.33333334, %v4643_v33  ;;  %v77_v58 = vmul.f32 0.33333334, %v4641_v34  ;;  %v78_v60 = vmul.f32 0.33333334, %v4640_v35  ;;  %v96_v63 = vfloor.f32 %v72_v51 }
  0x12   :  { %4769 = vst [vmem:[#allocation6_spill] sm:$0xff] %v3181_v59  ;;  %v79_v61 = vmul.f32 0.33333334, %v4629_v36  ;;  %v80_v62 = vmul.f32 0.33333334, %v4630_v37  ;;  %v97_v6 = vfloor.f32 %v73_v54  ;;  %v98_v51 = vfloor.f32 %v74_v55 }
  0x13   :  { %v81_v0 = vmul.f32 0.33333334, %v4631_v38  ;;  %v82_v1 = vmul.f32 0.33333334, %v4632_v39  ;;  %v83_v2 = vmul.f32 0.33333334, %v4633_v40  ;;  %v99_v54 = vfloor.f32 %v75_v56 }
  0x14   :  { %v84_v7 = vmul.f32 0.33333334, %v4634_v41  ;;  %v85_v36 = vmul.f32 0.33333334, %v4635_v42  ;;  %v86_v37 = vmul.f32 0.33333334, %v4636_v43  ;;  %v100_v55 = vfloor.f32 %v76_v57 }
  0x15   :  { %v87_v38 = vmul.f32 0.33333334, %v4637_v44  ;;  %v88_v39 = vmul.f32 0.33333334, %v4638_v45  ;;  %v89_v40 = vmul.f32 0.33333334, %v4639_v46  ;;  %v101_v56 = vfloor.f32 %v77_v58 }
  0x16   :  { %v90_v41 = vmul.f32 0.33333334, %v4642_v47  ;;  %v91_v42 = vmul.f32 0.33333334, %v4645_v48  ;;  %v92_v43 = vmul.f32 0.33333334, %v4648_v49  ;;  %v102_v35 = vfloor.f32 %v78_v60 }
  0x17   :  { %v93_v44 = vmul.f32 0.33333334, %v4651_v50  ;;  %v94_v45 = vmul.f32 0.33333334, %v4654_v52  ;;  %v95_v46 = vmul.f32 0.33333334, %v4657_v53  ;;  %v103_v34 = vfloor.f32 %v79_v61 }
  0x18   :  { %v104_v47 = vfloor.f32 %v80_v62  ;;  %v105_v33 = vfloor.f32 %v81_v0  ;;  %v106_v32 = vfloor.f32 %v82_v1  ;;  %v107_v48 = vfloor.f32 %v83_v2 }
  0x19   :  { %v108_v31 = vfloor.f32 %v84_v7  ;;  %v109_v30 = vfloor.f32 %v85_v36  ;;  %v110_v49 = vfloor.f32 %v86_v37  ;;  %v111_v57 = vfloor.f32 %v87_v38 }
  0x1a   :  { %v112_v29 = vfloor.f32 %v88_v39  ;;  %v113_v59 = vfloor.f32 %v89_v40  ;;  %v114_v50 = vfloor.f32 %v90_v41  ;;  %v115_v26 = vfloor.f32 %v91_v42 }
  0x1b   :  { %v116_v27 = vfloor.f32 %v92_v43  ;;  %v117_v52 = vfloor.f32 %v93_v44  ;;  %v118_v25 = vfloor.f32 %v94_v45  ;;  %v119_v28 = vfloor.f32 %v95_v46 }
  0x1c   :  { %v120_v53 = vmul.f32 3.0, %v96_v63  ;;  %v121_v58 = vmul.f32 3.0, %v97_v6  ;;  %v122_v60 = vmul.f32 3.0, %v98_v51  ;;  %v123_v61 = vmul.f32 3.0, %v99_v54 }
  0x1d   :  { %v124_v62 = vmul.f32 3.0, %v100_v55  ;;  %v125_v0 = vmul.f32 3.0, %v101_v56  ;;  %v126_v1 = vmul.f32 3.0, %v102_v35  ;;  %v127_v2 = vmul.f32 3.0, %v103_v34 }
  0x1e   :  { %v128_v7 = vmul.f32 3.0, %v104_v47  ;;  %v129_v36 = vmul.f32 3.0, %v105_v33  ;;  %v130_v37 = vmul.f32 3.0, %v106_v32  ;;  %v131_v38 = vmul.f32 3.0, %v107_v48 }
  0x1f   :  { %v132_v39 = vmul.f32 3.0, %v108_v31  ;;  %v133_v40 = vmul.f32 3.0, %v109_v30  ;;  %v134_v41 = vmul.f32 3.0, %v110_v49  ;;  %v135_v42 = vmul.f32 3.0, %v111_v57 }
  0x20   :  { %v136_v43 = vmul.f32 3.0, %v112_v29  ;;  %v137_v44 = vmul.f32 3.0, %v113_v59  ;;  %v138_v45 = vmul.f32 3.0, %v114_v50  ;;  %v139_v46 = vmul.f32 3.0, %v115_v26 }
  0x21   :  { %v140_v63 = vmul.f32 3.0, %v116_v27  ;;  %v141_v6 = vmul.f32 3.0, %v117_v52  ;;  %v142_v51 = vmul.f32 3.0, %v118_v25  ;;  %v143_v54 = vmul.f32 3.0, %v119_v28 }
  0x22   :  { %v4770_v55 = vcvt.s32.f32 %v3074_v3  ;;  %v4771_v33 = vcvt.s32.f32 %v3077_v4  ;;  %v4772_v30 = vcvt.s32.f32 %v3080_v5  ;;  %v4773_v29 = vcvt.s32.f32 %v3083_v8 }
  0x23   :  { %v4774_v26 = vcvt.s32.f32 %v3086_v9  ;;  %v4775_v3 = vcvt.s32.f32 %v3089_v10  ;;  %v4776_v4 = vcvt.s32.f32 %v3092_v11  ;;  %v4777_v5 = vcvt.s32.f32 %v3095_v12 }
  0x24   :  { %v3221_v35 = vsub.f32 %v4770_v55, %v120_v53  ;;  %v3225_v32 = vsub.f32 %v4771_v33, %v121_v58  ;;  %v3229_v31 = vsub.f32 %v4772_v30, %v122_v60  ;;  %v3233_v34 = vsub.f32 %v4773_v29, %v123_v61 }
  0x25   :  { %v3237_v25 = vsub.f32 %v4774_v26, %v124_v62  ;;  %v3241_v27 = vsub.f32 %v4775_v3, %v125_v0  ;;  %v3245_v28 = vsub.f32 %v4776_v4, %v126_v1  ;;  %v3249_v47 = vsub.f32 %v4777_v5, %v127_v2  ;;  %v4790_v0 = vld [vmem:[#allocation2_spill] sm:$0xff]  ;;  %v4792_v2 = vld [vmem:[#allocation3_spill] sm:$0xff] }
  0x26   :  { %v4778_v8 = vcvt.s32.f32 %v3098_v13  ;;  %v4779_v9 = vcvt.s32.f32 %v3101_v14  ;;  %v4780_v10 = vcvt.s32.f32 %v3104_v15  ;;  %v4781_v11 = vcvt.s32.f32 %v3107_v16 }
  0x27   :  { %v4782_v12 = vcvt.s32.f32 %v3110_v17  ;;  %v4783_v13 = vcvt.s32.f32 %v3113_v18  ;;  %v4784_v14 = vcvt.s32.f32 %v3116_v19  ;;  %v4785_v15 = vcvt.s32.f32 %v3119_v20 }
  0x28   :  { %v3253_v48 = vsub.f32 %v4778_v8, %v128_v7  ;;  %v3257_v49 = vsub.f32 %v4779_v9, %v129_v36  ;;  %v3261_v50 = vsub.f32 %v4780_v10, %v130_v37  ;;  %v3265_v52 = vsub.f32 %v4781_v11, %v131_v38  ;;  %v4794_v36 = vld [vmem:[#allocation4_spill] sm:$0xff]  ;;  %v4796_v38 = vld [vmem:[#allocation5_spill] sm:$0xff] }
  0x29   :  { %v3269_v53 = vsub.f32 %v4782_v12, %v132_v39  ;;  %v3273_v59 = vsub.f32 %v4783_v13, %v133_v40  ;;  %v3277_v56 = vsub.f32 %v4784_v14, %v134_v41  ;;  %v3281_v57 = vsub.f32 %v4785_v15, %v135_v42 }
  0x2a   :  { %v4786_v16 = vcvt.s32.f32 %v3122_v21  ;;  %v4787_v17 = vcvt.s32.f32 %v3125_v22  ;;  %v4788_v18 = vcvt.s32.f32 %v3128_v23  ;;  %v4789_v19 = vcvt.s32.f32 %v3131_v24 }
  0x2b   :  { %v4791_v20 = vcvt.s32.f32 %v4790_v0  ;;  %v4793_v21 = vcvt.s32.f32 %v4792_v2  ;;  %v4795_v22 = vcvt.s32.f32 %v4794_v36  ;;  %v4797_v23 = vcvt.s32.f32 %v4796_v38  ;;  %v3478_v36 = vld [vmem:[%s4626_s0] sm:$0xff] }
  0x2c   :  { %v3285_v58 = vsub.f32 %v4786_v16, %v136_v43  ;;  %v3289_v60 = vsub.f32 %v4787_v17, %v137_v44  ;;  %v3293_v61 = vsub.f32 %v4788_v18, %v138_v45  ;;  %v3297_v62 = vsub.f32 %v4789_v19, %v139_v46  ;;  %v4827_v19 = vld [vmem:[#allocation6_spill] sm:$0xff] }
  0x2d   :  { %v3301_v1 = vsub.f32 %v4791_v20, %v140_v63  ;;  %v3305_v7 = vsub.f32 %v4793_v21, %v141_v6  ;;  %v3309_v37 = vsub.f32 %v4795_v22, %v142_v51  ;;  %v3313_v39 = vsub.f32 %v4797_v23, %v143_v54 }
  0x2e   :  { %vm168_vm0 = vcmp.eq.f32.partialorder %v3221_v35, 0.0  ;;  %vm169_vm1 = vcmp.eq.f32.partialorder %v3225_v32, 0.0  ;;  %vm170_vm2 = vcmp.eq.f32.partialorder %v3229_v31, 0.0  ;;  %vm171_vm3 = vcmp.eq.f32.partialorder %v3233_v34, 0.0 }
  0x2f   :  { %vm172_vm4 = vcmp.eq.f32.partialorder %v3237_v25, 0.0  ;;  %vm173_vm5 = vcmp.eq.f32.partialorder %v3241_v27, 0.0  ;;  %vm182_vm14 = vcmp.eq.f32.partialorder %v3277_v56, 0.0  ;;  %vm183_vm15 = vcmp.eq.f32.partialorder %v3281_v57, 0.0 }
  0x30   :  { %vm184_vm6 = vcmp.eq.f32.partialorder %v3285_v58, 0.0  ;;  %vm185_vm7 = vcmp.eq.f32.partialorder %v3289_v60, 0.0  ;;  %vm186_vm8 = vcmp.eq.f32.partialorder %v3293_v61, 0.0  ;;  %vm187_vm9 = vcmp.eq.f32.partialorder %v3297_v62, 0.0 }
  0x31   :  { %vm188_vm10 = vcmp.eq.f32.partialorder %v3301_v1, 0.0  ;;  %vm189_vm11 = vcmp.eq.f32.partialorder %v3305_v7, 0.0  ;;  %vm190_vm12 = vcmp.eq.f32.partialorder %v3309_v37, 0.0  ;;  %vm191_vm13 = vcmp.eq.f32.partialorder %v3313_v39, 0.0 }
  0x32   :  { %v4658_v24 = vmov 0.0  }
  0x33   :  { %v3342_v40 = vsel %vm168_vm0, 1.0, %v4658_v24  ;;  %v3347_v41 = vsel %vm169_vm1, 1.0, %v4658_v24  ;;  %v3352_v42 = vsel %vm170_vm2, 1.0, %v4658_v24  ;;  %v3357_v43 = vsel %vm171_vm3, 1.0, %v4658_v24 }
  0x34   :  { %4798 = vst [vmem:[#allocation2_spill] sm:$0xff] %v3357_v43  ;;  %v3362_v44 = vsel %vm172_vm4, 1.0, %v4658_v24  ;;  %v3367_v45 = vsel %vm173_vm5, 1.0, %v4658_v24  ;;  %vm4801_vm0 = vcmp.eq.f32.partialorder %v3245_v28, 0.0  ;;  %vm4803_vm1 = vcmp.eq.f32.partialorder %v3249_v47, 0.0 }
  0x35   :  { %4799 = vst [vmem:[#allocation3_spill] sm:$0xff] %v3362_v44  ;;  %4800 = vst [vmem:[#allocation4_spill] sm:$0xff] %v3367_v45  ;;  %v3372_v46 = vsel %vm4801_vm0, 1.0, %v4658_v24  ;;  %v3377_v63 = vsel %vm4803_vm1, 1.0, %v4658_v24  ;;  %vm4805_vm2 = vcmp.eq.f32.partialorder %v3253_v48, 0.0  ;;  %vm4807_vm3 = vcmp.eq.f32.partialorder %v3257_v49, 0.0 }
  0x36   :  { %4802 = vst [vmem:[#allocation5_spill] sm:$0xff] %v3372_v46  ;;  %4804 = vst [vmem:[#allocation7_spill] sm:$0xff] %v3377_v63  ;;  %v3382_v6 = vsel %vm4805_vm2, 1.0, %v4658_v24  ;;  %v3387_v51 = vsel %vm4807_vm3, 1.0, %v4658_v24  ;;  %vm4809_vm4 = vcmp.eq.f32.partialorder %v3261_v50, 0.0  ;;  %vm4811_vm5 = vcmp.eq.f32.partialorder %v3265_v52, 0.0 }
  0x37   :  { %4806 = vst [vmem:[#allocation8_spill] sm:$0xff] %v3382_v6  ;;  %4808 = vst [vmem:[#allocation9_spill] sm:$0xff] %v3387_v51  ;;  %v3392_v54 = vsel %vm4809_vm4, 1.0, %v4658_v24  ;;  %v3397_v55 = vsel %vm4811_vm5, 1.0, %v4658_v24  ;;  %vm4813_vm0 = vcmp.eq.f32.partialorder %v3269_v53, 0.0  ;;  %vm4815_vm1 = vcmp.eq.f32.partialorder %v3273_v59, 0.0 }
  0x38   :  { %4810 = vst [vmem:[#allocation10_spill] sm:$0xff] %v3392_v54  ;;  %4812 = vst [vmem:[#allocation11_spill] sm:$0xff] %v3397_v55  ;;  %v3402_v33 = vsel %vm4813_vm0, 1.0, %v4658_v24  ;;  %v3407_v30 = vsel %vm4815_vm1, 1.0, %v4658_v24  ;;  %v3412_v29 = vsel %vm182_vm14, 1.0, %v4658_v24  ;;  %v3417_v26 = vsel %vm183_vm15, 1.0, %v4658_v24 }
  0x39   :  { %4814 = vst [vmem:[#allocation12_spill] sm:$0xff] %v3402_v33  ;;  %4816 = vst [vmem:[#allocation13_spill] sm:$0xff] %v3407_v30  ;;  %v3422_v3 = vsel %vm184_vm6, 1.0, %v4658_v24  ;;  %v3427_v4 = vsel %vm185_vm7, 1.0, %v4658_v24  ;;  %v3432_v5 = vsel %vm186_vm8, 1.0, %v4658_v24  ;;  %v3437_v8 = vsel %vm187_vm9, 1.0, %v4658_v24 }
  0x3a   :  { %4817 = vst [vmem:[#allocation14_spill] sm:$0xff] %v3412_v29  ;;  %4818 = vst [vmem:[#allocation15_spill] sm:$0xff] %v3417_v26  ;;  %v3442_v9 = vsel %vm188_vm10, 1.0, %v4658_v24  ;;  %v3447_v10 = vsel %vm189_vm11, 1.0, %v4658_v24  ;;  %v336_v11 = vcombine.low %v3342_v40, %v3347_v41  ;;  %v337_v12 = vcombine.low %v3352_v42, %v3357_v43 }
  0x3b   :  { %4819 = vst [vmem:[#allocation16_spill] sm:$0xff] %v3422_v3  ;;  %4820 = vst [vmem:[#allocation17_spill] sm:$0xff] %v3427_v4  ;;  %v353_v13 = vcombine.low %v3362_v44, %v3367_v45  ;;  %v354_v14 = vcombine.low %v3372_v46, %v3377_v63  ;;  %v3460_v15 = vsel %vm190_vm12, 1.0, %v4658_v24  ;;  %v3465_v16 = vsel %vm191_vm13, 1.0, %v4658_v24 }
  0x3c   :  { %4821 = vst [vmem:[#allocation18_spill] sm:$0xff] %v3432_v5  ;;  %4822 = vst [vmem:[#allocation19_spill] sm:$0xff] %v3437_v8  ;;  %v370_v17 = vcombine.low %v3382_v6, %v3387_v51  ;;  %v371_v18 = vcombine.low %v3392_v54, %v3397_v55  ;;  %v344_v0 = vrot.slane %v336_v11, %v4827_v19  ;;  %vm582_vm6 = vcmask 1041408  }
  0x3d   :  { %4823 = vst [vmem:[#allocation20_spill] sm:$0xff] %v3442_v9  ;;  %4824 = vst [vmem:[#allocation21_spill] sm:$0xff] %v3447_v10  ;;  %v351_v20 = vrot.slane %v337_v12, %v4827_v19  ;;  %v361_v2 = vrot.slane %v353_v13, %v4827_v19  ;;  %v368_v21 = vrot.slane %v354_v14, %v4827_v19  ;;  %vm216_vm7 = vcmp.eq.f32.partialorder %v3221_v35, 1.0 }
  0x3e   :  { %4825 = vst [vmem:[#allocation22_spill] sm:$0xff] %v3460_v15  ;;  %4826 = vst [vmem:[#allocation23_spill] sm:$0xff] %v3465_v16  ;;  %v387_v22 = vcombine.low %v3402_v33, %v3407_v30  ;;  %v388_v38 = vcombine.low %v3412_v29, %v3417_v26  ;;  %v378_v11 = vrot.slane %v370_v17, %v4827_v19  ;;  %v3501_v17 = vld [vmem:[%s4626_s0 + $0x8] sm:$0xff]  ;;  %vm217_vm8 = vcmp.eq.f32.partialorder %v3225_v32, 1.0 }
  0x3f   :  { %v3484_v23 = vcombine.low %v344_v0, %v351_v20  ;;  %v404_v12 = vcombine.low %v3422_v3, %v3427_v4  ;;  %v405_v13 = vcombine.low %v3432_v5, %v3437_v8  ;;  %v3491_v14 = vcombine.low %v361_v2, %v368_v21 }
  0x40   :  { %v385_v24 = vrot.slane %v371_v18, %v4827_v19  ;;  %v421_v30 = vcombine.low %v3442_v9, %v3447_v10  ;;  %v422_v26 = vcombine.low %v3460_v15, %v3465_v16  ;;  %v395_v20 = vrot.slane %v387_v22, %v4827_v19  ;;  %v3519_v22 = vld [vmem:[%s4626_s0 + $0x10] sm:$0xff] }
  0x41   :  { %4828 = vst [vmem:[#allocation24_spill] sm:$0xff] %v3484_v23  ;;  %4829 = vst [vmem:[#allocation25_spill] sm:$0xff] %v3491_v14  ;;  %v444_v0 = vmul.f32 %v3484_v23, %v3478_v36  ;;  %v402_v2 = vrot.slane %v388_v38, %v4827_v19  ;;  %v412_v18 = vrot.slane %v404_v12, %v4827_v19  ;;  %vm218_vm9 = vcmp.eq.f32.partialorder %v3229_v31, 1.0 }
  0x42   :  { %v419_v21 = vrot.slane %v405_v13, %v4827_v19  ;;  %v3510_v16 = vcombine.low %v378_v11, %v385_v24  ;;  %v429_v15 = vrot.slane %v421_v30, %v4827_v19  ;;  %v436_v8 = vrot.slane %v422_v26, %v4827_v19  ;;  %v3527_v24 = vld [vmem:[%s4626_s0 + $0x18] sm:$0xff]  ;;  %v3534_v11 = vld [vmem:[%s4626_s0 + $0x20] sm:$0xff] }
  0x43   :  { %v456_v10 = vcombine.high %v444_v0, %v444_v0  ;;  %v463_v9 = vrot.slane %v444_v0, %v4827_v19  ;;  %v445_v23 = vmul.f32 %v3491_v14, %v3501_v17  ;;  %v3522_v12 = vcombine.low %v395_v20, %v402_v2  ;;  %v3544_v14 = vld [vmem:[%s4626_s0 + $0x28] sm:$0xff] }
  0x44   :  { %4830 = vst [vmem:[#allocation26_spill] sm:$0xff] %v3510_v16  ;;  %v3529_v30 = vcombine.low %v412_v18, %v419_v21  ;;  %v3536_v0 = vcombine.low %v429_v15, %v436_v8  ;;  %vm219_vm10 = vcmp.eq.f32.partialorder %v3233_v34, 1.0  ;;  %vm220_vm11 = vcmp.eq.f32.partialorder %v3237_v25, 1.0 }
  0x45   :  { %v470_v38 = vrot.slane %v456_v10, %v4827_v19  ;;  %4831 = vst [vmem:[#allocation27_spill] sm:$0xff] %v3522_v12  ;;  %v471_v13 = vcombine.high %v463_v9, %v463_v9  ;;  %v473_v26 = vcombine.high %v445_v23, %v445_v23  ;;  %v446_v10 = vmul.f32 %v3510_v16, %v3519_v22 }
  0x46   :  { %4832 = vst [vmem:[#allocation28_spill] sm:$0xff] %v3529_v30  ;;  %4833 = vst [vmem:[#allocation29_spill] sm:$0xff] %v3536_v0  ;;  %v480_v2 = vrot.slane %v445_v23, %v4827_v19  ;;  %v583_v18 = vsel %vm582_vm6, %v463_v9, 0.0  ;;  %v447_v21 = vmul.f32 %v3522_v12, %v3527_v24  ;;  %v448_v15 = vmul.f32 %v3529_v30, %v3534_v11 }
  0x47   :  { %v472_v20 = vcombine.high %v470_v38, %v470_v38  ;;  %v490_v5 = vcombine.high %v446_v10, %v446_v10  ;;  %v584_v8 = vsel %vm582_vm6, %v471_v13, 0.0  ;;  %v487_v16 = vrot.slane %v473_v26, %v4827_v19 }
  0x48   :  { %v585_v4 = vadd.f32 %v584_v8, %v583_v18  ;;  %v586_v23 = vsel %vm582_vm6, %v470_v38, 0.0  ;;  %v449_v3 = vmul.f32 %v3536_v0, %v3544_v14  ;;  %v488_v29 = vcombine.high %v480_v2, %v480_v2 }
  0x49   :  { %v507_v33 = vcombine.high %v447_v21, %v447_v21  ;;  %v588_v9 = vsel %vm582_vm6, %v472_v20, 0.0  ;;  %v497_v12 = vrot.slane %v446_v10, %v4827_v19  ;;  %v524_v54 = vcombine.high %v448_v15, %v448_v15 }
  0x4a   :  { %v587_v55 = vadd.f32 %v586_v23, %v585_v4  ;;  %v541_v13 = vcombine.high %v449_v3, %v449_v3  ;;  %v590_v51 = vsel %vm582_vm6, %v480_v2, 0.0  ;;  %v504_v30 = vrot.slane %v490_v5, %v4827_v19 }
  0x4b   :  { %v489_v18 = vcombine.high %v487_v16, %v487_v16  ;;  %v514_v38 = vrot.slane %v447_v21, %v4827_v19  ;;  %v521_v8 = vrot.slane %v507_v33, %v4827_v19  ;;  %v592_v0 = vsel %vm582_vm6, %v488_v29, 0.0 }
  0x4c   :  { %v589_v26 = vadd.f32 %v588_v9, %v587_v55  ;;  %v531_v6 = vrot.slane %v448_v15, %v4827_v19  ;;  %v548_v4 = vrot.slane %v449_v3, %v4827_v19  ;;  %v505_v10 = vcombine.high %v497_v12, %v497_v12 }
  0x4d   :  { %v538_v23 = vrot.slane %v524_v54, %v4827_v19  ;;  %v3567_v2 = vrot.slane %v541_v13, %v4827_v19  ;;  %v594_v55 = vsel %vm582_vm6, %v487_v16, 0.0  ;;  %v506_v5 = vcombine.high %v504_v30, %v504_v30 }
  0x4e   :  { %v591_v20 = vadd.f32 %v590_v51, %v589_v26  ;;  %v522_v21 = vcombine.high %v514_v38, %v514_v38  ;;  %v523_v63 = vcombine.high %v521_v8, %v521_v8  ;;  %v596_v33 = vsel %vm582_vm6, %v489_v18, 0.0 }
  0x4f   :  { %v539_v29 = vcombine.high %v531_v6, %v531_v6  ;;  %v556_v46 = vcombine.high %v548_v4, %v548_v4  ;;  %v540_v45 = vcombine.high %v538_v23, %v538_v23  ;;  %v598_v54 = vsel %vm582_vm6, %v497_v12, 0.0 }
  0x50   :  { %v593_v9 = vadd.f32 %v592_v0, %v591_v20  ;;  %v600_v3 = vsel %vm582_vm6, %v505_v10, 0.0  ;;  %v602_v16 = vsel %vm582_vm6, %v504_v30, 0.0  ;;  %v604_v0 = vsel %vm582_vm6, %v506_v5, 0.0 }
  0x51   :  { %v606_v26 = vsel %vm582_vm6, %v514_v38, 0.0  ;;  %v608_v18 = vsel %vm582_vm6, %v522_v21, 0.0  ;;  %v610_v20 = vsel %vm582_vm6, %v521_v8, 0.0  ;;  %v3588_v12 = vsel %vm582_vm6, %v539_v29, 0.0 }
  0x52   :  { %v595_v15 = vadd.f32 %v594_v55, %v593_v9  ;;  %v612_v55 = vsel %vm582_vm6, %v523_v63, 0.0  ;;  %v3582_v9 = vsel %vm582_vm6, %v531_v6, 0.0  ;;  %vm221_vm12 = vcmp.eq.f32.partialorder %v3241_v27, 1.0 }
  0x53   :  { %v3594_v6 = vsel %vm582_vm6, %v538_v23, 0.0  ;;  %vm222_vm13 = vcmp.eq.f32.partialorder %v3245_v28, 1.0  ;;  %vm223_vm14 = vcmp.eq.f32.partialorder %v3249_v47, 1.0  ;;  %v3599_v30 = vsel %vm582_vm6, %v540_v45, 0.0 }
  0x54   :  { %v597_v13 = vadd.f32 %v596_v33, %v595_v15  ;;  %v4834_v38 = vmov 0.0   ;;  %v3620_v45 = vsel %vm582_vm6, %v548_v4, 0.0  ;;  %v3623_v15 = vsel %vm582_vm6, %v556_v46, 0.0 }
  0x55   :  { %v3602_v8 = vsel %vm216_vm7, 1.0, %v4834_v38  ;;  %v3605_v10 = vsel %vm217_vm8, 1.0, %v4834_v38  ;;  %v3608_v5 = vsel %vm218_vm9, 1.0, %v4834_v38  ;;  %v3611_v23 = vsel %vm219_vm10, 1.0, %v4834_v38 }
  0x56   :  { %v599_v51 = vadd.f32 %v598_v54, %v597_v13  ;;  %4835 = vst [vmem:[#allocation30_spill] sm:$0xff] %v3602_v8  ;;  %4836 = vst [vmem:[#allocation31_spill] sm:$0xff] %v3605_v10  ;;  %v3614_v33 = vsel %vm220_vm11, 1.0, %v4834_v38  ;;  %v3617_v29 = vsel %vm221_vm12, 1.0, %v4834_v38  ;;  %v3629_v54 = vsel %vm223_vm14, 1.0, %v4834_v38 }
  0x57   :  { %4837 = vst [vmem:[#allocation32_spill] sm:$0xff] %v3608_v5  ;;  %4838 = vst [vmem:[#allocation33_spill] sm:$0xff] %v3611_v23  ;;  %vm224_vm15 = vcmp.eq.f32.partialorder %v3253_v48, 1.0  ;;  %vm225_vm2 = vcmp.eq.f32.partialorder %v3257_v49, 1.0  ;;  %vm226_vm3 = vcmp.eq.f32.partialorder %v3261_v50, 1.0  ;;  %vm227_vm4 = vcmp.eq.f32.partialorder %v3265_v52, 1.0 }
  0x58   :  { %v601_v63 = vadd.f32 %v600_v3, %v599_v51  ;;  %4839 = vst [vmem:[#allocation34_spill] sm:$0xff] %v3614_v33  ;;  %4840 = vst [vmem:[#allocation35_spill] sm:$0xff] %v3617_v29  ;;  %v3626_v51 = vsel %vm222_vm13, 1.0, %v4834_v38  ;;  %v658_v4 = vcombine.low %v3602_v8, %v3605_v10  ;;  %v659_v46 = vcombine.low %v3608_v5, %v3611_v23 }
  0x59   :  { %4841 = vst [vmem:[#allocation36_spill] sm:$0xff] %v3626_v51  ;;  %4842 = vst [vmem:[#allocation37_spill] sm:$0xff] %v3629_v54  ;;  %v675_v13 = vcombine.low %v3614_v33, %v3617_v29  ;;  %vm228_vm5 = vcmp.eq.f32.partialorder %v3269_v53, 1.0  ;;  %vm229_vm0 = vcmp.eq.f32.partialorder %v3273_v59, 1.0  ;;  %vm230_vm1 = vcmp.eq.f32.partialorder %v3277_v56, 1.0 }
  0x5a   :  { %v603_v21 = vadd.f32 %v602_v16, %v601_v63  ;;  %vm231_vm7 = vcmp.eq.f32.partialorder %v3281_v57, 1.0  ;;  %v666_v63 = vrot.slane %v658_v4, %v4827_v19  ;;  %vm232_vm8 = vcmp.eq.f32.partialorder %v3285_v58, 1.0 }
  0x5b   :  { %vm233_vm9 = vcmp.eq.f32.partialorder %v3289_v60, 1.0  ;;  %vm234_vm10 = vcmp.eq.f32.partialorder %v3293_v61, 1.0  ;;  %vm235_vm11 = vcmp.eq.f32.partialorder %v3297_v62, 1.0  ;;  %vm236_vm12 = vcmp.eq.f32.partialorder %v3301_v1, 1.0 }
  0x5c   :  { %v605_v3 = vadd.f32 %v604_v0, %v603_v21  ;;  %v676_v0 = vcombine.low %v3626_v51, %v3629_v54  ;;  %v673_v21 = vrot.slane %v659_v46, %v4827_v19  ;;  %v683_v54 = vrot.slane %v675_v13, %v4827_v19 }
  0x5d   :  { %v3669_v46 = vsel %vm226_vm3, 1.0, %v4834_v38  ;;  %v3703_v29 = vsel %vm232_vm8, 1.0, %v4834_v38  ;;  %v3715_v10 = vsel %vm233_vm9, 1.0, %v4834_v38  ;;  %vm237_vm13 = vcmp.eq.f32.partialorder %v3305_v7, 1.0 }
  0x5e   :  { %v607_v16 = vadd.f32 %v606_v26, %v605_v3  ;;  %v3655_v26 = vsel %vm224_vm15, 1.0, %v4834_v38  ;;  %v3657_v3 = vcombine.low %v666_v63, %v673_v21  ;;  %v690_v4 = vrot.slane %v676_v0, %v4827_v19  ;;  %4846 = vst [vmem:[#allocation41_spill] sm:$0xff] %v3669_v46  ;;  %4852 = vst [vmem:[#allocation47_spill] sm:$0xff] %v3703_v29 }
  0x5f   :  { %4843 = vst [vmem:[#allocation38_spill] sm:$0xff] %v3655_v26  ;;  %v3691_v0 = vsel %vm230_vm1, 1.0, %v4834_v38  ;;  %v3696_v63 = vsel %vm231_vm7, 1.0, %v4834_v38  ;;  %4854 = vst [vmem:[#allocation49_spill] sm:$0xff] %v3715_v10  ;;  %vm238_vm14 = vcmp.eq.f32.partialorder %v3309_v37, 1.0  ;;  %vm239_vm15 = vcmp.eq.f32.partialorder %v3313_v39, 1.0 }
  0x60   :  { %v609_v23 = vadd.f32 %v608_v18, %v607_v16  ;;  %4844 = vst [vmem:[#allocation39_spill] sm:$0xff] %v3657_v3  ;;  %v3664_v18 = vsel %vm225_vm2, 1.0, %v4834_v38  ;;  %v3674_v16 = vsel %vm227_vm4, 1.0, %v4834_v38  ;;  %4850 = vst [vmem:[#allocation45_spill] sm:$0xff] %v3691_v0  ;;  %v766_v21 = vmul.f32 %v3657_v3, %v3478_v36 }
  0x61   :  { %4845 = vst [vmem:[#allocation40_spill] sm:$0xff] %v3664_v18  ;;  %4847 = vst [vmem:[#allocation42_spill] sm:$0xff] %v3674_v16  ;;  %v3705_v33 = vcombine.low %v683_v54, %v690_v4  ;;  %v3720_v3 = vsel %vm234_vm10, 1.0, %v4834_v38  ;;  %v3725_v4 = vsel %vm235_vm11, 1.0, %v4834_v38  ;;  %vm264_vm2 = vcmp.eq.f32.partialorder %v3221_v35, 2.0 }
  0x62   :  { %v611_v51 = vadd.f32 %v610_v20, %v609_v23  ;;  %v3681_v20 = vsel %vm228_vm5, 1.0, %v4834_v38  ;;  %v3686_v23 = vsel %vm229_vm0, 1.0, %v4834_v38  ;;  %4851 = vst [vmem:[#allocation46_spill] sm:$0xff] %v3696_v63  ;;  %4855 = vst [vmem:[#allocation50_spill] sm:$0xff] %v3720_v3  ;;  %v778_v54 = vcombine.high %v766_v21, %v766_v21 }
  0x63   :  { %4848 = vst [vmem:[#allocation43_spill] sm:$0xff] %v3681_v20  ;;  %4849 = vst [vmem:[#allocation44_spill] sm:$0xff] %v3686_v23  ;;  %vm265_vm3 = vcmp.eq.f32.partialorder %v3225_v32, 2.0  ;;  %vm266_vm4 = vcmp.eq.f32.partialorder %v3229_v31, 2.0  ;;  %vm267_vm5 = vcmp.eq.f32.partialorder %v3233_v34, 2.0  ;;  %vm268_vm0 = vcmp.eq.f32.partialorder %v3237_v25, 2.0 }
  0x64   :  { %v613_v13 = vadd.f32 %v612_v55, %v611_v51  ;;  %4853 = vst [vmem:[#allocation48_spill] sm:$0xff] %v3705_v33  ;;  %v692_v55 = vcombine.low %v3655_v26, %v3664_v18  ;;  %v693_v51 = vcombine.low %v3669_v46, %v3674_v16  ;;  %4856 = vst [vmem:[#allocation51_spill] sm:$0xff] %v3725_v4  ;;  %vm269_vm1 = vcmp.eq.f32.partialorder %v3241_v27, 2.0 }
  0x65   :  { %v709_v16 = vcombine.low %v3681_v20, %v3686_v23  ;;  %v767_v23 = vmul.f32 %v3705_v33, %v3501_v17  ;;  %v792_v20 = vrot.slane %v778_v54, %v4827_v19  ;;  %vm270_vm7 = vcmp.eq.f32.partialorder %v3245_v28, 2.0 }
  0x66   :  { %v615_v5 = vadd.f32 %v3582_v9, %v613_v13  ;;  %v710_v9 = vcombine.low %v3691_v0, %v3696_v63  ;;  %v785_v13 = vrot.slane %v766_v21, %v4827_v19  ;;  %v700_v18 = vrot.slane %v692_v55, %v4827_v19 }
  0x67   :  { %v707_v26 = vrot.slane %v693_v51, %v4827_v19  ;;  %v727_v21 = vcombine.low %v3720_v3, %v3725_v4  ;;  %v3752_v55 = vsel %vm237_vm13, 1.0, %v4834_v38  ;;  %v717_v51 = vrot.slane %v709_v16, %v4827_v19 }
  0x68   :  { %v617_v46 = vadd.f32 %v3588_v12, %v615_v5  ;;  %v3745_v12 = vsel %vm236_vm12, 1.0, %v4834_v38  ;;  %v726_v5 = vcombine.low %v3703_v29, %v3715_v10  ;;  %4857 = vst [vmem:[#allocation52_spill] sm:$0xff] %v3752_v55  ;;  %v724_v54 = vrot.slane %v710_v9, %v4827_v19 }
  0x69   :  { %v793_v33 = vcombine.high %v785_v13, %v785_v13  ;;  %v3762_v10 = vsel %vm238_vm14, 1.0, %v4834_v38  ;;  %v3767_v4 = vsel %vm239_vm15, 1.0, %v4834_v38  ;;  %v3769_v3 = vcombine.low %v700_v18, %v707_v26 }
  0x6a   :  { %v619_v63 = vadd.f32 %v3594_v6, %v617_v46  ;;  %v626_v46 = vsel %vm582_vm6, %v3567_v2, 0.0  ;;  %4858 = vst [vmem:[#allocation53_spill] sm:$0xff] %v3762_v10  ;;  %4859 = vst [vmem:[#allocation54_spill] sm:$0xff] %v3767_v4  ;;  %v794_v16 = vcombine.high %v792_v20, %v792_v20  ;;  %v795_v9 = vcombine.high %v767_v23, %v767_v23 }
  0x6b   :  { %4860 = vst [vmem:[#allocation55_spill] sm:$0xff] %v3769_v3  ;;  %v802_v29 = vrot.slane %v767_v23, %v4827_v19  ;;  %v741_v0 = vrot.slane %v727_v21, %v4827_v19  ;;  %v743_v8 = vcombine.low %v3745_v12, %v3752_v55  ;;  %v3777_v44 = vcombine.low %v717_v51, %v724_v54 }
  0x6c   :  { %v621_v6 = vadd.f32 %v3599_v30, %v619_v63  ;;  %v734_v63 = vrot.slane %v726_v5, %v4827_v19  ;;  %v744_v43 = vcombine.low %v3762_v10, %v3767_v4  ;;  %v904_v26 = vsel %vm582_vm6, %v785_v13, 0.0 }
  0x6d   :  { %4861 = vst [vmem:[#allocation56_spill] sm:$0xff] %v3777_v44  ;;  %v905_v18 = vsel %vm582_vm6, %v793_v33, 0.0  ;;  %v768_v51 = vmul.f32 %v3769_v3, %v3519_v22  ;;  %v809_v54 = vrot.slane %v795_v9, %v4827_v19  ;;  %v810_v4 = vcombine.high %v802_v29, %v802_v29 }
  0x6e   :  { %v623_v30 = vadd.f32 %v3620_v45, %v621_v6  ;;  %v4862_v45 = vcombine.high %v3567_v2, %v3567_v2  ;;  %v906_v21 = vadd.f32 %v905_v18, %v904_v26  ;;  %v907_v6 = vsel %vm582_vm6, %v792_v20, 0.0 }
  0x6f   :  { %v909_v13 = vsel %vm582_vm6, %v794_v16, 0.0  ;;  %v3793_v33 = vcombine.low %v734_v63, %v741_v0  ;;  %v758_v2 = vrot.slane %v744_v43, %v4827_v19  ;;  %v769_v26 = vmul.f32 %v3777_v44, %v3527_v24  ;;  %v4917_v44 = vld [vmem:[#allocation31_spill] sm:$0xff] }
  0x70   :  { %v625_v23 = vadd.f32 %v3623_v15, %v623_v30  ;;  %v628_v5 = vsel %vm582_vm6, %v4862_v45, 0.0  ;;  %v908_v15 = vadd.f32 %v907_v6, %v906_v21  ;;  %v751_v30 = vrot.slane %v743_v8, %v4827_v19 }
  0x71   :  { %4863 = vst [vmem:[#allocation57_spill] sm:$0xff] %v3793_v33  ;;  %v911_v20 = vsel %vm582_vm6, %v802_v29, 0.0  ;;  %v812_v45 = vcombine.high %v768_v51, %v768_v51  ;;  %v811_v9 = vcombine.high %v809_v54, %v809_v54  ;;  %v819_v55 = vrot.slane %v768_v51, %v4827_v19 }
  0x72   :  { %v627_v10 = vadd.f32 %v626_v46, %v625_v23  ;;  %v910_v3 = vadd.f32 %v909_v13, %v908_v15  ;;  %v829_v16 = vcombine.high %v769_v26, %v769_v26  ;;  %v913_v0 = vsel %vm582_vm6, %v810_v4, 0.0 }
  0x73   :  { %v770_v8 = vmul.f32 %v3793_v33, %v3534_v11  ;;  %v3804_v43 = vcombine.low %v751_v30, %v758_v2  ;;  %v915_v63 = vsel %vm582_vm6, %v809_v54, 0.0  ;;  %v826_v29 = vrot.slane %v812_v45, %v4827_v19  ;;  %v4916_v33 = vld [vmem:[#allocation30_spill] sm:$0xff] }
  0x74   :  { %v629_v18 = vadd.f32 %v628_v5, %v627_v10  ;;  %v912_v46 = vadd.f32 %v911_v20, %v910_v3  ;;  %v836_v10 = vrot.slane %v769_v26, %v4827_v19  ;;  %v827_v5 = vcombine.high %v819_v55, %v819_v55 }
  0x75   :  { %4864 = vst [vmem:[#allocation58_spill] sm:$0xff] %v3804_v43  ;;  %v843_v21 = vrot.slane %v829_v16, %v4827_v19  ;;  %v846_v6 = vcombine.high %v770_v8, %v770_v8  ;;  %v917_v4 = vsel %vm582_vm6, %v811_v9, 0.0  ;;  %v3812_v51 = vrot.slane %v770_v8, %v4827_v19 }
  0x76   :  { %630 = vadd.xlane.f32.xlu0 %v629_v18  ;;  %v914_v23 = vadd.f32 %v913_v0, %v912_v46  ;;  %v771_v3 = vmul.f32 %v3804_v43, %v3544_v14  ;;  %v919_v54 = vsel %vm582_vm6, %v819_v55, 0.0  ;;  %v828_v15 = vcombine.high %v826_v29, %v826_v29  ;;  %v4915_v43 = vld [vmem:[#allocation23_spill] sm:$0xff] }
  0x77   :  { %v844_v30 = vcombine.high %v836_v10, %v836_v10  ;;  %v845_v26 = vcombine.high %v843_v21, %v843_v21  ;;  %v3818_v20 = vrot.slane %v846_v6, %v4827_v19  ;;  %v921_v45 = vsel %vm582_vm6, %v827_v5, 0.0 }
  0x78   :  { %v916_v13 = vadd.f32 %v915_v63, %v914_v23  ;;  %v863_v18 = vcombine.high %v771_v3, %v771_v3  ;;  %v861_v9 = vcombine.high %v3812_v51, %v3812_v51  ;;  %v923_v0 = vsel %vm582_vm6, %v826_v29, 0.0 }
  0x79   :  { %vm271_vm8 = vcmp.eq.f32.partialorder %v3249_v47, 2.0  ;;  %v3833_v8 = vrot.slane %v771_v3, %v4827_v19  ;;  %v925_v35 = vsel %vm582_vm6, %v828_v15, 0.0  ;;  %v927_v32 = vsel %vm582_vm6, %v836_v10, 0.0 }
  0x7a   :  { %v918_v2 = vadd.f32 %v917_v4, %v916_v13  ;;  %v3838_v31 = vsel %vm264_vm2, 1.0, %v4834_v38  ;;  %v3841_v25 = vsel %vm265_vm3, 1.0, %v4834_v38  ;;  %v3844_v27 = vsel %vm266_vm4, 1.0, %v4834_v38 }
  0x7b   :  { %4865 = vst [vmem:[#allocation59_spill] sm:$0xff] %v3838_v31  ;;  %4866 = vst [vmem:[#allocation60_spill] sm:$0xff] %v3841_v25  ;;  %v3847_v28 = vsel %vm267_vm5, 1.0, %v4834_v38  ;;  %v3850_v47 = vsel %vm268_vm0, 1.0, %v4834_v38  ;;  %v3853_v46 = vsel %vm269_vm1, 1.0, %v4834_v38  ;;  %v3856_v63 = vsel %vm270_vm7, 1.0, %v4834_v38 }
  0x7c   :  { %v920_v16 = vadd.f32 %v919_v54, %v918_v2  ;;  %4867 = vst [vmem:[#allocation61_spill] sm:$0xff] %v3844_v27  ;;  %4868 = vst [vmem:[#allocation62_spill] sm:$0xff] %v3847_v28  ;;  %v3859_v29 = vsel %vm271_vm8, 1.0, %v4834_v38  ;;  %v3862_v10 = vrot.slane %v863_v18, %v4827_v19  ;;  %v929_v5 = vsel %vm582_vm6, %v844_v30, 0.0 }
  0x7d   :  { %4869 = vst [vmem:[#allocation63_spill] sm:$0xff] %v3850_v47  ;;  %4870 = vst [vmem:[#allocation64_spill] sm:$0xff] %v3853_v46  ;;  %vm272_vm9 = vcmp.eq.f32.partialorder %v3253_v48, 2.0  ;;  %vm273_vm10 = vcmp.eq.f32.partialorder %v3257_v49, 2.0  ;;  %vm274_vm11 = vcmp.eq.f32.partialorder %v3261_v50, 2.0  ;;  %v978_v6 = vcombine.low %v3838_v31, %v3841_v25 }
  0x7e   :  { %v922_v55 = vadd.f32 %v921_v45, %v920_v16  ;;  %4871 = vst [vmem:[#allocation65_spill] sm:$0xff] %v3856_v63  ;;  %4872 = vst [vmem:[#allocation66_spill] sm:$0xff] %v3859_v29  ;;  %v979_v4 = vcombine.low %v3844_v27, %v3847_v28  ;;  %vm275_vm12 = vcmp.eq.f32.partialorder %v3265_v52, 2.0  ;;  %v995_v3 = vcombine.low %v3850_v47, %v3853_v46 }
  0x7f   :  { %v996_v54 = vcombine.low %v3856_v63, %v3859_v29  ;;  %v931_v48 = vsel %vm582_vm6, %v843_v21, 0.0  ;;  %v933_v49 = vsel %vm582_vm6, %v845_v26, 0.0  ;;  %v986_v50 = vrot.slane %v978_v6, %v4827_v19 }
  0x80   :  { %v924_v34 = vadd.f32 %v923_v0, %v922_v55  ;;  %v993_v15 = vrot.slane %v979_v4, %v4827_v19  ;;  %v3882_v2 = vsel %vm272_vm9, 1.0, %v4834_v38  ;;  %v3885_v52 = vsel %vm273_vm10, 1.0, %v4834_v38 }
  0x81   :  { %4873 = vst [vmem:[#allocation67_spill] sm:$0xff] %v3882_v2  ;;  %4874 = vst [vmem:[#allocation68_spill] sm:$0xff] %v3885_v52  ;;  %v3888_v18 = vsel %vm274_vm11, 1.0, %v4834_v38  ;;  %v3891_v45 = vsel %vm275_vm12, 1.0, %v4834_v38  ;;  %v1003_v26 = vrot.slane %v995_v3, %v4827_v19  ;;  %v1010_v16 = vrot.slane %v996_v54, %v4827_v19 }
  0x82   :  { %v926_v23 = vadd.f32 %v925_v35, %v924_v34  ;;  %4875 = vst [vmem:[#allocation69_spill] sm:$0xff] %v3888_v18  ;;  %4876 = vst [vmem:[#allocation70_spill] sm:$0xff] %v3891_v45  ;;  %v3893_v21 = vcombine.low %v986_v50, %v993_v15  ;;  %v862_v0 = vcombine.high %v3818_v20, %v3818_v20  ;;  %v935_v34 = vsel %vm582_vm6, %v3812_v51, 0.0 }
  0x83   :  { %v878_v35 = vcombine.high %v3833_v8, %v3833_v8  ;;  %vm276_vm13 = vcmp.eq.f32.partialorder %v3269_v53, 2.0  ;;  %v1013_v6 = vcombine.low %v3888_v18, %v3891_v45  ;;  %v939_v3 = vsel %vm582_vm6, %v3818_v20, 0.0  ;;  %v4932_v45 = vld [vmem:[#allocation47_spill] sm:$0xff]  ;;  %v4933_v18 = vld [vmem:[#allocation49_spill] sm:$0xff] }
  0x84   :  { %v928_v13 = vadd.f32 %v927_v32, %v926_v23  ;;  %4877 = vst [vmem:[#allocation71_spill] sm:$0xff] %v3893_v21  ;;  %v879_v32 = vcombine.high %v3862_v10, %v3862_v10  ;;  %v1086_v4 = vmul.f32 %v3893_v21, %v3478_v36  ;;  %vm277_vm14 = vcmp.eq.f32.partialorder %v3273_v59, 2.0  ;;  %v4914_v21 = vld [vmem:[#allocation22_spill] sm:$0xff] }
  0x85   :  { %v3916_v51 = vcombine.low %v1003_v26, %v1010_v16  ;;  %vm278_vm15 = vcmp.eq.f32.partialorder %v3277_v56, 2.0  ;;  %vm279_vm2 = vcmp.eq.f32.partialorder %v3281_v57, 2.0  ;;  %v943_v36 = vsel %vm582_vm6, %v3833_v8, 0.0 }
  0x86   :  { %v930_v30 = vadd.f32 %v929_v5, %v928_v13  ;;  %v1012_v5 = vcombine.low %v3882_v2, %v3885_v52  ;;  %v937_v13 = vsel %vm582_vm6, %v861_v9, 0.0  ;;  %v1098_v54 = vcombine.high %v1086_v4, %v1086_v4  ;;  %v4934_v52 = vld [vmem:[#allocation50_spill] sm:$0xff]  ;;  %v4935_v2 = vld [vmem:[#allocation51_spill] sm:$0xff] }
  0x87   :  { %4878 = vst [vmem:[#allocation72_spill] sm:$0xff] %v3916_v51  ;;  %v3924_v9 = vsel %vm276_vm13, 1.0, %v4834_v38  ;;  %v1105_v20 = vrot.slane %v1086_v4, %v4827_v19  ;;  %v3928_v59 = vsel %vm277_vm14, 1.0, %v4834_v38  ;;  %v1027_v56 = vrot.slane %v1013_v6, %v4827_v19 }
  0x88   :  { %v932_v55 = vadd.f32 %v931_v48, %v930_v30  ;;  %v941_v48 = vsel %vm582_vm6, %v862_v0, 0.0  ;;  %4879 = vst [vmem:[#allocation73_spill] sm:$0xff] %v3924_v9  ;;  %4880 = vst [vmem:[#allocation74_spill] sm:$0xff] %v3928_v59  ;;  %v1020_v50 = vrot.slane %v1012_v5, %v4827_v19  ;;  %v3933_v57 = vsel %vm278_vm15, 1.0, %v4834_v38 }
  0x89   :  { %4881 = vst [vmem:[#allocation75_spill] sm:$0xff] %v3933_v57  ;;  %v3936_v15 = vsel %vm279_vm2, 1.0, %v4834_v38  ;;  %v1087_v8 = vmul.f32 %v3916_v51, %v3501_v17  ;;  %v1112_v30 = vrot.slane %v1098_v54, %v4827_v19  ;;  %v945_v16 = vsel %vm582_vm6, %v878_v35, 0.0  ;;  %v4913_v51 = vld [vmem:[#allocation21_spill] sm:$0xff] }
  0x8a   :  { %v934_v23 = vadd.f32 %v933_v49, %v932_v55  ;;  %4882 = vst [vmem:[#allocation76_spill] sm:$0xff] %v3936_v15  ;;  %v947_v0 = vsel %vm582_vm6, %v3862_v10, 0.0  ;;  %vm280_vm3 = vcmp.eq.f32.partialorder %v3285_v58, 2.0  ;;  %vm281_vm4 = vcmp.eq.f32.partialorder %v3289_v60, 2.0 }
  0x8b   :  { %vm282_vm5 = vcmp.eq.f32.partialorder %v3293_v61, 2.0  ;;  %v1029_v55 = vcombine.low %v3924_v9, %v3928_v59  ;;  %vm283_vm0 = vcmp.eq.f32.partialorder %v3297_v62, 2.0  ;;  %v3950_v17 = vcombine.low %v1020_v50, %v1027_v56  ;;  %v4930_v59 = vld [vmem:[#allocation45_spill] sm:$0xff]  ;;  %v4931_v9 = vld [vmem:[#allocation46_spill] sm:$0xff] }
  0x8c   :  { %v936_v53 = vadd.f32 %v935_v34, %v934_v23  ;;  %v1113_v34 = vcombine.high %v1105_v20, %v1105_v20  ;;  %v1030_v35 = vcombine.low %v3933_v57, %v3936_v15  ;;  %v949_v10 = vsel %vm582_vm6, %v879_v32, 0.0  ;;  %v4928_v15 = vld [vmem:[#allocation43_spill] sm:$0xff]  ;;  %v4929_v57 = vld [vmem:[#allocation44_spill] sm:$0xff] }
  0x8d   :  { %4883 = vst [vmem:[#allocation77_spill] sm:$0xff] %v3950_v17  ;;  %v1114_v5 = vcombine.high %v1112_v30, %v1112_v30  ;;  %v1115_v58 = vcombine.high %v1087_v8, %v1087_v8  ;;  %v1122_v60 = vrot.slane %v1087_v8, %v4827_v19  ;;  %v3957_v61 = vsel %vm280_vm3, 1.0, %v4834_v38 }
  0x8e   :  { %v938_v49 = vadd.f32 %v937_v13, %v936_v53  ;;  %4884 = vst [vmem:[#allocation78_spill] sm:$0xff] %v3957_v61  ;;  %v3960_v4 = vsel %vm281_vm4, 1.0, %v4834_v38  ;;  %v3963_v62 = vsel %vm282_vm5, 1.0, %v4834_v38  ;;  %v3966_v13 = vsel %vm283_vm0, 1.0, %v4834_v38 }
  0x8f   :  { %4885 = vst [vmem:[#allocation79_spill] sm:$0xff] %v3960_v4  ;;  %4886 = vst [vmem:[#allocation80_spill] sm:$0xff] %v3963_v62  ;;  %v1224_v32 = vsel %vm582_vm6, %v1105_v20, 0.0  ;;  %v1225_v53 = vsel %vm582_vm6, %v1113_v34, 0.0  ;;  %v1129_v50 = vrot.slane %v1115_v58, %v4827_v19  ;;  %v1130_v56 = vcombine.high %v1122_v60, %v1122_v60 }
  0x90   :  { %v940_v26 = vadd.f32 %v939_v3, %v938_v49  ;;  %4887 = vst [vmem:[#allocation81_spill] sm:$0xff] %v3966_v13  ;;  %v1037_v3 = vrot.slane %v1029_v55, %v4827_v19  ;;  %v1226_v49 = vadd.f32 %v1225_v53, %v1224_v32  ;;  %v1227_v8 = vsel %vm582_vm6, %v1112_v30, 0.0 }
  0x91   :  { %vm284_vm1 = vcmp.eq.f32.partialorder %v3301_v1, 2.0  ;;  %vm285_vm7 = vcmp.eq.f32.partialorder %v3305_v7, 2.0  ;;  %vm286_vm8 = vcmp.eq.f32.partialorder %v3309_v37, 2.0  ;;  %vm287_vm9 = vcmp.eq.f32.partialorder %v3313_v39, 2.0 }
  0x92   :  { %v942_v23 = vadd.f32 %v941_v48, %v940_v26  ;;  %v1044_v48 = vrot.slane %v1030_v35, %v4827_v19  ;;  %v1229_v26 = vsel %vm582_vm6, %v1114_v5, 0.0  ;;  %v1228_v20 = vadd.f32 %v1227_v8, %v1226_v49 }
  0x93   :  { %v1047_v30 = vcombine.low %v3963_v62, %v3966_v13  ;;  %v1131_v35 = vcombine.high %v1129_v50, %v1129_v50  ;;  %v3993_v53 = vsel %vm284_vm1, 1.0, %v4834_v38  ;;  %v4923_v13 = vld [vmem:[#allocation37_spill] sm:$0xff]  ;;  %v4924_v62 = vld [vmem:[#allocation38_spill] sm:$0xff] }
  0x94   :  { %v944_v6 = vadd.f32 %v943_v36, %v942_v23  ;;  %v1088_v36 = vmul.f32 %v3950_v17, %v3519_v22  ;;  %v1046_v22 = vcombine.low %v3957_v61, %v3960_v4  ;;  %v3984_v34 = vcombine.low %v1037_v3, %v1044_v48  ;;  %4889 = vst [vmem:[#allocation83_spill] sm:$0xff] %v3993_v53  ;;  %v4912_v17 = vld [vmem:[#allocation20_spill] sm:$0xff]  ;;  %v4927_v61 = vld [vmem:[#allocation42_spill] sm:$0xff] }
  0x95   :  { %v1235_v3 = vsel %vm582_vm6, %v1129_v50, 0.0  ;;  %v1061_v48 = vrot.slane %v1047_v30, %v4827_v19  ;;  %v4925_v4 = vld [vmem:[#allocation40_spill] sm:$0xff] }
  0x96   :  { %v946_v54 = vadd.f32 %v945_v16, %v944_v6  ;;  %v1231_v16 = vsel %vm582_vm6, %v1122_v60, 0.0  ;;  %4888 = vst [vmem:[#allocation82_spill] sm:$0xff] %v3984_v34  ;;  %v1132_v5 = vcombine.high %v1088_v36, %v1088_v36  ;;  %v1139_v58 = vrot.slane %v1088_v36, %v4827_v19 }
  0x97   :  { %v1233_v6 = vsel %vm582_vm6, %v1130_v56, 0.0  ;;  %v4003_v60 = vsel %vm286_vm8, 1.0, %v4834_v38  ;;  %v1054_v1 = vrot.slane %v1046_v22, %v4827_v19  ;;  %v1089_v7 = vmul.f32 %v3984_v34, %v3527_v24  ;;  %v4911_v34 = vld [vmem:[#allocation19_spill] sm:$0xff] }
  0x98   :  { %v948_v23 = vadd.f32 %v947_v0, %v946_v54  ;;  %v1230_v0 = vadd.f32 %v1229_v26, %v1228_v20  ;;  %4891 = vst [vmem:[#allocation85_spill] sm:$0xff] %v4003_v60  ;;  %v4009_v54 = vsel %vm287_vm9, 1.0, %v4834_v38  ;;  %v1146_v49 = vrot.slane %v1132_v5, %v4827_v19 }
  0x99   :  { %4892 = vst [vmem:[#allocation86_spill] sm:$0xff] %v4009_v54  ;;  %v1147_v37 = vcombine.high %v1139_v58, %v1139_v58  ;;  %v1237_v56 = vsel %vm582_vm6, %v1131_v35, 0.0  ;;  %v1239_v50 = vsel %vm582_vm6, %v1139_v58, 0.0  ;;  %v4018_v26 = vcombine.low %v1054_v1, %v1061_v48 }
  0x9a   :  { %v950_v55 = vadd.f32 %v949_v10, %v948_v23  ;;  %v1232_v32 = vadd.f32 %v1231_v16, %v1230_v0  ;;  %v3998_v10 = vsel %vm285_vm7, 1.0, %v4834_v38  ;;  %v1064_v38 = vcombine.low %v4003_v60, %v4009_v54  ;;  %v4919_v54 = vld [vmem:[#allocation33_spill] sm:$0xff]  ;;  %v4920_v60 = vld [vmem:[#allocation34_spill] sm:$0xff] }
  0x9b   :  { %4890 = vst [vmem:[#allocation84_spill] sm:$0xff] %v3998_v10  ;;  %4893 = vst [vmem:[#allocation87_spill] sm:$0xff] %v4018_v26  ;;  %v1063_v39 = vcombine.low %v3993_v53, %v3998_v10  ;;  %v1148_v20 = vcombine.high %v1146_v49, %v1146_v49  ;;  %v1149_v22 = vcombine.high %v1089_v7, %v1089_v7  ;;  %v1241_v16 = vsel %vm582_vm6, %v1147_v37, 0.0  ;;  %v4921_v10 = vld [vmem:[#allocation35_spill] sm:$0xff]  ;;  %v4922_v53 = vld [vmem:[#allocation36_spill] sm:$0xff] }
  0x9c   :  { %951 = vadd.xlane.f32.xlu0 %v950_v55  ;;  %v1234_v36 = vadd.f32 %v1233_v6, %v1232_v32  ;;  %v1156_v24 = vrot.slane %v1089_v7, %v4827_v19  ;;  %v1243_v30 = vsel %vm582_vm6, %v1146_v49, 0.0  ;;  %v1078_v35 = vrot.slane %v1064_v38, %v4827_v19 }
  0x9d   :  { %v1071_v0 = vrot.slane %v1063_v39, %v4827_v19  ;;  %v1090_v58 = vmul.f32 %v4018_v26, %v3534_v11  ;;  %v1163_v6 = vrot.slane %v1149_v22, %v4827_v19  ;;  %v4910_v26 = vld [vmem:[#allocation18_spill] sm:$0xff] }
  0x9e   :  { %v1236_v8 = vadd.f32 %v1235_v3, %v1234_v36  ;;  %v1164_v32 = vcombine.high %v1156_v24, %v1156_v24  ;;  %v1245_v3 = vsel %vm582_vm6, %v1148_v20, 0.0  ;;  %v1247_v48 = vsel %vm582_vm6, %v1156_v24, 0.0 }
  0x9f   :  { %v4034_v36 = vcombine.low %v1071_v0, %v1078_v35  ;;  %v1165_v49 = vcombine.high %v1163_v6, %v1163_v6  ;;  %v1166_v37 = vcombine.high %v1090_v58, %v1090_v58  ;;  %v1251_v11 = vsel %vm582_vm6, %v1163_v6, 0.0 }
  0xa0   :  { %v1238_v23 = vadd.f32 %v1237_v56, %v1236_v8  ;;  %v1173_v56 = vrot.slane %v1090_v58, %v4827_v19  ;;  %v1249_v8 = vsel %vm582_vm6, %v1164_v32, 0.0 }
  0xa1   :  { %4894 = vst [vmem:[#allocation88_spill] sm:$0xff] %v4034_v36  ;;  %v1091_v38 = vmul.f32 %v4034_v36, %v3544_v14  ;;  %v1253_v22 = vsel %vm582_vm6, %v1165_v49, 0.0  ;;  %v4909_v36 = vld [vmem:[#allocation17_spill] sm:$0xff] }
  0xa2   :  { %v1240_v55 = vadd.f32 %v1239_v50, %v1238_v23  ;;  %v1180_v23 = vrot.slane %v1166_v37, %v4827_v19  ;;  %v1181_v20 = vcombine.high %v1173_v56, %v1173_v56 }
  0xa3   :  { %v1183_v0 = vcombine.high %v1091_v38, %v1091_v38  ;;  %v1190_v35 = vrot.slane %v1091_v38, %v4827_v19 }
  0xa4   :  { %v1242_v5 = vadd.f32 %v1241_v16, %v1240_v55  ;;  %v1255_v16 = vsel %vm582_vm6, %v1173_v56, 0.0  ;;  %v1259_v6 = vsel %vm582_vm6, %v1180_v23, 0.0 }
  0xa5   :  { %v1197_v14 = vrot.slane %v1183_v0, %v4827_v19  ;;  %v4895_v0 = vld [vmem:[#allocation2_spill] sm:$0xff]  ;;  %v4918_v19 = vld [vmem:[#allocation32_spill] sm:$0xff] }
  0xa6   :  { %v1244_v1 = vadd.f32 %v1243_v30, %v1242_v5  ;;  %v1182_v30 = vcombine.high %v1180_v23, %v1180_v23  ;;  %v1257_v5 = vsel %vm582_vm6, %v1181_v20, 0.0 }
  0xa7   :  { %v1199_v37 = vcombine.high %v1197_v14, %v1197_v14 }
  0xa8   :  { %v1246_v7 = vadd.f32 %v1245_v3, %v1244_v1  ;;  %v1198_v3 = vcombine.high %v1190_v35, %v1190_v35  ;;  %v1261_v1 = vsel %vm582_vm6, %v1182_v30, 0.0 }
  0xaa   :  { %v1248_v50 = vadd.f32 %v1247_v48, %v1246_v7  ;;  %v1263_v7 = vsel %vm582_vm6, %v1190_v35, 0.0  ;;  %v1265_v56 = vsel %vm582_vm6, %v1198_v3, 0.0  ;;  %v4898_v3 = vld [vmem:[#allocation5_spill] sm:$0xff] }
  0xac   :  { %v1250_v39 = vadd.f32 %v1249_v8, %v1248_v50  ;;  %v1267_v50 = vsel %vm582_vm6, %v1197_v14, 0.0 }
  0xae   :  { %v1252_v24 = vadd.f32 %v1251_v11, %v1250_v39  ;;  %v1269_v39 = vsel %vm582_vm6, %v1199_v37, 0.0 }
  0xb0   :  { %v1254_v55 = vadd.f32 %v1253_v22, %v1252_v24 }
  0xb2   :  { %v1256_v58 = vadd.f32 %v1255_v16, %v1254_v55 }
  0xb4   :  { %v1258_v32 = vadd.f32 %v1257_v5, %v1256_v58  ;;  %v4896_v5 = vld [vmem:[#allocation3_spill] sm:$0xff] }
  0xb6   :  { %v1260_v48 = vadd.f32 %v1259_v6, %v1258_v32  ;;  %v4897_v6 = vld [vmem:[#allocation4_spill] sm:$0xff] }
  0xb8   :  { %v1262_v49 = vadd.f32 %v1261_v1, %v1260_v48  ;;  %v4899_v48 = vld [vmem:[#allocation7_spill] sm:$0xff] }
  0xba   :  { %v1264_v8 = vadd.f32 %v1263_v7, %v1262_v49  ;;  %v4900_v49 = vld [vmem:[#allocation8_spill] sm:$0xff] }
  0xbc   :  { %v1266_v11 = vadd.f32 %v1265_v56, %v1264_v8  ;;  %v4901_v56 = vld [vmem:[#allocation9_spill] sm:$0xff] }
  0xbe   :  { %v1268_v38 = vadd.f32 %v1267_v50, %v1266_v11 }
  0xc0   :  { %v1270_v23 = vadd.f32 %v1269_v39, %v1268_v38  ;;  %v4905_v38 = vld [vmem:[#allocation13_spill] sm:$0xff] }
  0xc2   :  { %1271 = vadd.xlane.f32.xlu1 %v1270_v23 }
 0x103   :  { %v631_v20 = vpop.xlane.xlu0 %630 }
 0x104   :  { %v633_v22 = vmul.f32 0.0009765625, %v631_v20  ;;  %v4906_v20 = vld [vmem:[#allocation14_spill] sm:$0xff] }
 0x106   :  { %v1274_v16 = vmul.f32 %v633_v22, %v3342_v40  ;;  %v1275_v55 = vmul.f32 %v633_v22, %v3347_v41  ;;  %v1276_v30 = vmul.f32 %v633_v22, %v3352_v42  ;;  %v1277_v35 = vmul.f32 %v633_v22, %v4895_v0  ;;  %v4902_v40 = vld [vmem:[#allocation10_spill] sm:$0xff]  ;;  %v4903_v41 = vld [vmem:[#allocation11_spill] sm:$0xff]  ;;  %v4904_v42 = vld [vmem:[#allocation12_spill] sm:$0xff] }
 0x107   :  { %v1278_v58 = vmul.f32 %v633_v22, %v4896_v5  ;;  %v1279_v32 = vmul.f32 %v633_v22, %v4897_v6  ;;  %v1280_v1 = vmul.f32 %v633_v22, %v4898_v3  ;;  %v1281_v7 = vmul.f32 %v633_v22, %v4899_v48  ;;  %v4907_v5 = vld [vmem:[#allocation15_spill] sm:$0xff]  ;;  %v4908_v6 = vld [vmem:[#allocation16_spill] sm:$0xff] }
 0x108   :  { %v1282_v37 = vmul.f32 %v633_v22, %v4900_v49  ;;  %v1283_v8 = vmul.f32 %v633_v22, %v4901_v56  ;;  %v1284_v50 = vmul.f32 %v633_v22, %v4902_v40  ;;  %v1285_v11 = vmul.f32 %v633_v22, %v4903_v41 }
 0x109   :  { %v1286_v39 = vmul.f32 %v633_v22, %v4904_v42  ;;  %v1287_v23 = vmul.f32 %v633_v22, %v4905_v38  ;;  %v1288_v0 = vmul.f32 %v633_v22, %v4906_v20  ;;  %v1290_v3 = vmul.f32 %v633_v22, %v4908_v6 }
 0x10a   :  { %v1291_v48 = vmul.f32 %v633_v22, %v4909_v36  ;;  %v1292_v49 = vmul.f32 %v633_v22, %v4910_v26  ;;  %v1293_v56 = vmul.f32 %v633_v22, %v4911_v34  ;;  %v1294_v40 = vmul.f32 %v633_v22, %v4912_v17 }
 0x10b   :  { %v1295_v41 = vmul.f32 %v633_v22, %v4913_v51  ;;  %v1296_v42 = vmul.f32 %v633_v22, %v4914_v21  ;;  %v1297_v38 = vmul.f32 %v633_v22, %v4915_v43 }
 0x129   :  { %v952_v24 = vpop.xlane.xlu0 %951 }
 0x12a   :  { %v953_v14 = vmul.f32 0.0009765625, %v952_v24  ;;  %v1289_v24 = vmul.f32 %v633_v22, %v4907_v5  ;;  %v4926_v22 = vld [vmem:[#allocation41_spill] sm:$0xff] }
 0x12c   :  { %v1298_v20 = vmul.f32 %v953_v14, %v4916_v33  ;;  %v1299_v5 = vmul.f32 %v953_v14, %v4917_v44  ;;  %v1300_v6 = vmul.f32 %v953_v14, %v4918_v19  ;;  %v1301_v36 = vmul.f32 %v953_v14, %v4919_v54 }
 0x12d   :  { %v1302_v26 = vmul.f32 %v953_v14, %v4920_v60  ;;  %v1303_v34 = vmul.f32 %v953_v14, %v4921_v10  ;;  %v1304_v17 = vmul.f32 %v953_v14, %v4922_v53  ;;  %v1305_v51 = vmul.f32 %v953_v14, %v4923_v13 }
 0x12e   :  { %v1306_v21 = vmul.f32 %v953_v14, %v4924_v62  ;;  %v1307_v43 = vmul.f32 %v953_v14, %v4925_v4  ;;  %v1308_v33 = vmul.f32 %v953_v14, %v4926_v22  ;;  %v1309_v44 = vmul.f32 %v953_v14, %v4927_v61  ;;  %v4936_v61 = vld [vmem:[#allocation52_spill] sm:$0xff] }
 0x12f   :  { %v1310_v19 = vmul.f32 %v953_v14, %v4928_v15  ;;  %v1311_v54 = vmul.f32 %v953_v14, %v4929_v57  ;;  %v1312_v60 = vmul.f32 %v953_v14, %v4930_v59  ;;  %v1313_v10 = vmul.f32 %v953_v14, %v4931_v9  ;;  %v4937_v15 = vld [vmem:[#allocation53_spill] sm:$0xff]  ;;  %v4938_v57 = vld [vmem:[#allocation54_spill] sm:$0xff] }
 0x130   :  { %v1314_v53 = vmul.f32 %v953_v14, %v4932_v45  ;;  %v1315_v13 = vmul.f32 %v953_v14, %v4933_v18  ;;  %v1316_v62 = vmul.f32 %v953_v14, %v4934_v52  ;;  %v1317_v4 = vmul.f32 %v953_v14, %v4935_v2 }
 0x131   :  { %v1318_v22 = vmul.f32 %v953_v14, %v3745_v12  ;;  %v1319_v63 = vmul.f32 %v953_v14, %v4936_v61  ;;  %v1320_v46 = vmul.f32 %v953_v14, %v4937_v15  ;;  %v1321_v47 = vmul.f32 %v953_v14, %v4938_v57 }
 0x132   :  { %v1322_v59 = vadd.f32 %v1298_v20, %v1274_v16  ;;  %v1323_v28 = vadd.f32 %v1299_v5, %v1275_v55  ;;  %v1324_v9 = vadd.f32 %v1300_v6, %v1276_v30  ;;  %v1325_v27 = vadd.f32 %v1301_v36, %v1277_v35 }
 0x133   :  { %v1326_v45 = vadd.f32 %v1302_v26, %v1278_v58  ;;  %v1327_v18 = vadd.f32 %v1303_v34, %v1279_v32  ;;  %v1328_v31 = vadd.f32 %v1304_v17, %v1280_v1  ;;  %v1329_v52 = vadd.f32 %v1305_v51, %v1281_v7  ;;  %v4940_v58 = vld [vmem:[#allocation60_spill] sm:$0xff]  ;;  %v4941_v1 = vld [vmem:[#allocation61_spill] sm:$0xff]  ;;  %v4947_v34 = vld [vmem:[#allocation67_spill] sm:$0xff] }
 0x134   :  { %v1330_v2 = vadd.f32 %v1306_v21, %v1282_v37  ;;  %v1331_v12 = vadd.f32 %v1307_v43, %v1283_v8  ;;  %v1332_v61 = vadd.f32 %v1308_v33, %v1284_v50  ;;  %v1333_v15 = vadd.f32 %v1309_v44, %v1285_v11  ;;  %v4942_v37 = vld [vmem:[#allocation62_spill] sm:$0xff]  ;;  %v4943_v50 = vld [vmem:[#allocation63_spill] sm:$0xff]  ;;  %v4948_v51 = vld [vmem:[#allocation68_spill] sm:$0xff] }
 0x135   :  { %v1334_v14 = vadd.f32 %v1310_v19, %v1286_v39  ;;  %v1335_v57 = vadd.f32 %v1311_v54, %v1287_v23  ;;  %v1336_v16 = vadd.f32 %v1312_v60, %v1288_v0  ;;  %v1337_v20 = vadd.f32 %v1313_v10, %v1289_v24  ;;  %v4944_v39 = vld [vmem:[#allocation64_spill] sm:$0xff]  ;;  %v4945_v0 = vld [vmem:[#allocation65_spill] sm:$0xff]  ;;  %v4950_v44 = vld [vmem:[#allocation70_spill] sm:$0xff] }
 0x136   :  { %v4101_v5 = vadd.f32 %v1314_v53, %v1290_v3  ;;  %v4103_v55 = vadd.f32 %v1315_v13, %v1291_v48  ;;  %v4105_v6 = vadd.f32 %v1316_v62, %v1292_v49  ;;  %v4107_v30 = vadd.f32 %v1317_v4, %v1293_v56  ;;  %v4946_v3 = vld [vmem:[#allocation66_spill] sm:$0xff]  ;;  %v4949_v43 = vld [vmem:[#allocation69_spill] sm:$0xff] }
 0x137   :  { %v1342_v49 = vadd.f32 %v1318_v22, %v1294_v40  ;;  %v1343_v36 = vadd.f32 %v1319_v63, %v1295_v41  ;;  %v1344_v56 = vadd.f32 %v1320_v46, %v1296_v42  ;;  %v1345_v26 = vadd.f32 %v1321_v47, %v1297_v38  ;;  %v4951_v40 = vld [vmem:[#allocation73_spill] sm:$0xff]  ;;  %v4952_v46 = vld [vmem:[#allocation74_spill] sm:$0xff]  ;;  %v4953_v41 = vld [vmem:[#allocation75_spill] sm:$0xff] }
 0x138   :  { %v4954_v38 = vld [vmem:[#allocation76_spill] sm:$0xff] }
 0x14f   :  { %v1272_v29 = vpop.xlane.xlu1 %1271 }
 0x150   :  { %v1273_v25 = vmul.f32 0.0009765625, %v1272_v29  ;;  %v4939_v29 = vld [vmem:[#allocation59_spill] sm:$0xff] }
 0x152   :  { %v1346_v35 = vmul.f32 %v1273_v25, %v4939_v29  ;;  %v1347_v32 = vmul.f32 %v1273_v25, %v4940_v58  ;;  %v1348_v7 = vmul.f32 %v1273_v25, %v4941_v1  ;;  %v1349_v8 = vmul.f32 %v1273_v25, %v4942_v37  ;;  %v4955_v58 = vld [vmem:[#allocation78_spill] sm:$0xff]  ;;  %v4956_v37 = vld [vmem:[#allocation79_spill] sm:$0xff] }
 0x153   :  { %v1350_v11 = vmul.f32 %v1273_v25, %v4943_v50  ;;  %v1351_v23 = vmul.f32 %v1273_v25, %v4944_v39  ;;  %v1352_v24 = vmul.f32 %v1273_v25, %v4945_v0  ;;  %v1353_v48 = vmul.f32 %v1273_v25, %v4946_v3 }
 0x154   :  { %v1354_v17 = vmul.f32 %v1273_v25, %v4947_v34  ;;  %v1355_v21 = vmul.f32 %v1273_v25, %v4948_v51  ;;  %v1356_v33 = vmul.f32 %v1273_v25, %v4949_v43  ;;  %v1357_v19 = vmul.f32 %v1273_v25, %v4950_v44  ;;  %v4963_v51 = vld [vmem:[#allocation6_spill] sm:$0xff] }
 0x155   :  { %v1370_v54 = vadd.f32 %v1346_v35, %v1322_v59  ;;  %v1371_v60 = vadd.f32 %v1347_v32, %v1323_v28  ;;  %v1372_v10 = vadd.f32 %v1348_v7, %v1324_v9  ;;  %v1373_v53 = vadd.f32 %v1349_v8, %v1325_v27  ;;  %v4957_v59 = vld [vmem:[#allocation80_spill] sm:$0xff]  ;;  %v4958_v9 = vld [vmem:[#allocation81_spill] sm:$0xff] }
 0x156   :  { %v1374_v13 = vadd.f32 %v1350_v11, %v1326_v45  ;;  %v1375_v62 = vadd.f32 %v1351_v23, %v1327_v18  ;;  %v1376_v4 = vadd.f32 %v1352_v24, %v1328_v31  ;;  %v1377_v29 = vadd.f32 %v1353_v48, %v1329_v52  ;;  %v4959_v11 = vld [vmem:[#allocation83_spill] sm:$0xff]  ;;  %v4960_v23 = vld [vmem:[#allocation84_spill] sm:$0xff]  ;;  %v4961_v24 = vld [vmem:[#allocation85_spill] sm:$0xff] }
 0x157   :  { %v1358_v63 = vmul.f32 %v1273_v25, %v4951_v40  ;;  %v1359_v47 = vmul.f32 %v1273_v25, %v4952_v46  ;;  %v1360_v42 = vmul.f32 %v1273_v25, %v4953_v41  ;;  %v1361_v22 = vmul.f32 %v1273_v25, %v4954_v38  ;;  %v4962_v48 = vld [vmem:[#allocation86_spill] sm:$0xff] }
 0x158   :  { %v1362_v1 = vmul.f32 %v1273_v25, %v4955_v58  ;;  %v1363_v50 = vmul.f32 %v1273_v25, %v4956_v37  ;;  %v1364_v28 = vmul.f32 %v1273_v25, %v4957_v59  ;;  %v1365_v27 = vmul.f32 %v1273_v25, %v4958_v9  ;;  %v4965_v58 = vld [vmem:[#allocation25_spill] sm:$0xff]  ;;  %v19_v37 = vld [vmem:[%s4627_s1 + $0x10] sm:$0xff] }
 0x159   :  { %v1378_v45 = vadd.f32 %v1354_v17, %v1330_v2  ;;  %v1379_v18 = vadd.f32 %v1355_v21, %v1331_v12  ;;  %v1380_v31 = vadd.f32 %v1356_v33, %v1332_v61  ;;  %v1381_v52 = vadd.f32 %v1357_v19, %v1333_v15  ;;  %v17_v61 = vld [vmem:[%s4627_s1] sm:$0xff] }
 0x15a   :  { %v1418_v35 = vcombine.low %v1370_v54, %v1371_v60  ;;  %v1419_v32 = vcombine.low %v1372_v10, %v1373_v53  ;;  %v1435_v7 = vcombine.low %v1374_v13, %v1375_v62  ;;  %v1436_v8 = vcombine.low %v1376_v4, %v1377_v29  ;;  %v18_v10 = vld [vmem:[%s4627_s1 + $0x8] sm:$0xff] }
 0x15b   :  { %v1366_v39 = vmul.f32 %v1273_v25, %v4959_v11  ;;  %v1367_v0 = vmul.f32 %v1273_v25, %v4960_v23  ;;  %v1368_v3 = vmul.f32 %v1273_v25, %v4961_v24  ;;  %v1369_v34 = vmul.f32 %v1273_v25, %v4962_v48  ;;  %v20_v11 = vld [vmem:[%s4627_s1 + $0x18] sm:$0xff]  ;;  %v4966_v48 = vld [vmem:[#allocation26_spill] sm:$0xff] }
 0x15c   :  { %v1426_v43 = vrot.slane %v1418_v35, %v4963_v51  ;;  %v1433_v44 = vrot.slane %v1419_v32, %v4963_v51  ;;  %v1443_v2 = vrot.slane %v1435_v7, %v4963_v51  ;;  %v1450_v12 = vrot.slane %v1436_v8, %v4963_v51 }
 0x15d   :  { %v1382_v15 = vadd.f32 %v1358_v63, %v1334_v14  ;;  %v1383_v17 = vadd.f32 %v1359_v47, %v1335_v57  ;;  %v1384_v21 = vadd.f32 %v1360_v42, %v1336_v16  ;;  %v1385_v33 = vadd.f32 %v1361_v22, %v1337_v20 }
 0x15e   :  { %v1434_v19 = vcombine.low %v1426_v43, %v1433_v44  ;;  %v4140_v54 = vcombine.low %v1443_v2, %v1450_v12  ;;  %v1452_v25 = vcombine.low %v1378_v45, %v1379_v18  ;;  %v1453_v60 = vcombine.low %v1380_v31, %v1381_v52  ;;  %v22_v44 = vld [vmem:[%s4627_s1 + $0x28] sm:$0xff] }
 0x15f   :  { %v1386_v53 = vadd.f32 %v1362_v1, %v4101_v5  ;;  %v1387_v13 = vadd.f32 %v1363_v50, %v4103_v55  ;;  %v1388_v62 = vadd.f32 %v1364_v28, %v4105_v6  ;;  %v1389_v14 = vadd.f32 %v1365_v27, %v4107_v30  ;;  %v4964_v55 = vld [vmem:[#allocation24_spill] sm:$0xff] }
 0x160   :  { %v1390_v57 = vadd.f32 %v1366_v39, %v1342_v49  ;;  %v1391_v16 = vadd.f32 %v1367_v0, %v1343_v36  ;;  %v4149_v20 = vsub.f32 %v17_v61, %v1434_v19  ;;  %v1392_v4 = vadd.f32 %v1368_v3, %v1344_v56  ;;  %v21_v0 = vld [vmem:[%s4627_s1 + $0x20] sm:$0xff] }
 0x161   :  { %v1393_v29 = vadd.f32 %v1369_v34, %v1345_v26  ;;  %v1469_v40 = vcombine.low %v1382_v15, %v1383_v17  ;;  %v1470_v63 = vcombine.low %v1384_v21, %v1385_v33  ;;  %v1460_v46 = vrot.slane %v1452_v25, %v4963_v51  ;;  %v3051_v33 = vld [vmem:[%s4626_s0] sm:$0xff] }
 0x162   :  { %v1467_v47 = vrot.slane %v1453_v60, %v4963_v51  ;;  %v4154_v5 = vsub.f32 %v18_v10, %v4140_v54  ;;  %v2100_v6 = vmul.f32 %v4149_v20, %v4964_v55  ;;  %v1486_v41 = vcombine.low %v1386_v53, %v1387_v13 }
 0x163   :  { %v1487_v30 = vcombine.low %v1388_v62, %v1389_v14  ;;  %v1477_v56 = vrot.slane %v1469_v40, %v4963_v51  ;;  %v1484_v26 = vrot.slane %v1470_v63, %v4963_v51  ;;  %v1503_v38 = vcombine.low %v1390_v57, %v1391_v16  ;;  %v4967_v62 = vld [vmem:[#allocation27_spill] sm:$0xff] }
 0x164   :  { %v2112_v49 = vcombine.high %v2100_v6, %v2100_v6  ;;  %v2119_v36 = vrot.slane %v2100_v6, %v4963_v51  ;;  %v4161_v42 = vcombine.low %v1460_v46, %v1467_v47  ;;  %v1504_v22 = vcombine.low %v1392_v4, %v1393_v29  ;;  %v4968_v29 = vld [vmem:[#allocation28_spill] sm:$0xff]  ;;  %v3052_v47 = vld [vmem:[%s4626_s0 + $0x8] sm:$0xff] }
 0x165   :  { %v2101_v1 = vmul.f32 %v4154_v5, %v4965_v58  ;;  %v1494_v28 = vrot.slane %v1486_v41, %v4963_v51  ;;  %v1501_v9 = vrot.slane %v1487_v30, %v4963_v51  ;;  %v4171_v27 = vcombine.low %v1477_v56, %v1484_v26  ;;  %v4969_v41 = vld [vmem:[#allocation29_spill] sm:$0xff] }
 0x166   :  { %v2126_v50 = vrot.slane %v2112_v49, %v4963_v51  ;;  %v2127_v59 = vcombine.high %v2119_v36, %v2119_v36  ;;  %v1511_v45 = vrot.slane %v1503_v38, %v4963_v51  ;;  %v1518_v18 = vrot.slane %v1504_v22, %v4963_v51 }
 0x167   :  { %v4176_v31 = vsub.f32 %v19_v37, %v4161_v42  ;;  %v2129_v52 = vcombine.high %v2101_v1, %v2101_v1  ;;  %v2136_v32 = vrot.slane %v2101_v1, %v4963_v51  ;;  %v2238_v7 = vsel %vm582_vm6, %v2119_v36, 0.0 }
 0x168   :  { %v2128_v35 = vcombine.high %v2126_v50, %v2126_v50  ;;  %v2239_v8 = vsel %vm582_vm6, %v2127_v59, 0.0  ;;  %v4184_v39 = vcombine.low %v1494_v28, %v1501_v9  ;;  %v2241_v24 = vsel %vm582_vm6, %v2126_v50, 0.0 }
 0x169   :  { %v2240_v23 = vadd.f32 %v2239_v8, %v2238_v7  ;;  %v4190_v3 = vcombine.low %v1511_v45, %v1518_v18  ;;  %v2102_v34 = vmul.f32 %v4176_v31, %v4966_v48  ;;  %v4198_v2 = vsub.f32 %v20_v11, %v4171_v27 }
 0x16a   :  { %v2143_v12 = vrot.slane %v2129_v52, %v4963_v51  ;;  %v2144_v61 = vcombine.high %v2136_v32, %v2136_v32  ;;  %v2243_v15 = vsel %vm582_vm6, %v2128_v35, 0.0  ;;  %v4203_v17 = vsub.f32 %v21_v0, %v4184_v39 }
 0x16b   :  { %v2242_v43 = vadd.f32 %v2241_v24, %v2240_v23  ;;  %v4208_v25 = vsub.f32 %v3051_v33, %v1434_v19  ;;  %v2245_v60 = vsel %vm582_vm6, %v2136_v32, 0.0  ;;  %v4212_v10 = vsub.f32 %v22_v44, %v4190_v3  ;;  %v3053_v24 = vld [vmem:[%s4626_s0 + $0x10] sm:$0xff] }
 0x16c   :  { %v2146_v53 = vcombine.high %v2102_v34, %v2102_v34  ;;  %v2103_v14 = vmul.f32 %v4198_v2, %v4967_v62  ;;  %v2145_v57 = vcombine.high %v2143_v12, %v2143_v12  ;;  %v2153_v16 = vrot.slane %v2102_v34, %v4963_v51 }
 0x16d   :  { %v2244_v21 = vadd.f32 %v2243_v15, %v2242_v43  ;;  %v2247_v4 = vsel %vm582_vm6, %v2144_v61, 0.0  ;;  %v2104_v40 = vmul.f32 %v4203_v17, %v4968_v29  ;;  %v1913_v63 = vmul.f32 %v4208_v25, %v4964_v55 }
 0x16e   :  { %v2249_v46 = vsel %vm582_vm6, %v2143_v12, 0.0  ;;  %v4227_v6 = vsub.f32 %v3052_v47, %v4140_v54  ;;  %v2105_v30 = vmul.f32 %v4212_v10, %v4969_v41  ;;  %v2160_v49 = vrot.slane %v2146_v53, %v4963_v51 }
 0x16f   :  { %v2246_v13 = vadd.f32 %v2245_v60, %v2244_v21  ;;  %v1925_v56 = vcombine.high %v1913_v63, %v1913_v63  ;;  %v2161_v26 = vcombine.high %v2153_v16, %v2153_v16  ;;  %v2163_v38 = vcombine.high %v2103_v14, %v2103_v14 }
 0x170   :  { %v2251_v55 = vsel %vm582_vm6, %v2145_v57, 0.0  ;;  %v1932_v22 = vrot.slane %v1913_v63, %v4963_v51  ;;  %v2170_v1 = vrot.slane %v2103_v14, %v4963_v51  ;;  %v2180_v37 = vcombine.high %v2104_v40, %v2104_v40 }
 0x171   :  { %v2248_v19 = vadd.f32 %v2247_v4, %v2246_v13  ;;  %v2253_v54 = vsel %vm582_vm6, %v2153_v16, 0.0  ;;  %v1914_v59 = vmul.f32 %v4227_v6, %v4965_v58  ;;  %v2162_v28 = vcombine.high %v2160_v49, %v2160_v49 }
 0x172   :  { %v1939_v45 = vrot.slane %v1925_v56, %v4963_v51  ;;  %v1940_v18 = vcombine.high %v1932_v22, %v1932_v22  ;;  %v2177_v52 = vrot.slane %v2163_v38, %v4963_v51  ;;  %v2187_v35 = vrot.slane %v2104_v40, %v4963_v51  ;;  %v3054_v40 = vld [vmem:[%s4626_s0 + $0x18] sm:$0xff] }
 0x173   :  { %v2250_v36 = vadd.f32 %v2249_v46, %v2248_v19  ;;  %v2197_v32 = vcombine.high %v2105_v30, %v2105_v30  ;;  %v2255_v7 = vsel %vm582_vm6, %v2161_v26, 0.0  ;;  %v2178_v8 = vcombine.high %v2170_v1, %v2170_v1 }
 0x174   :  { %v2194_v11 = vrot.slane %v2180_v37, %v4963_v51  ;;  %v4244_v23 = vrot.slane %v2105_v30, %v4963_v51  ;;  %v2257_v58 = vsel %vm582_vm6, %v2160_v49, 0.0  ;;  %v4251_v34 = vsub.f32 %v3053_v24, %v4161_v42 }
 0x175   :  { %v2252_v50 = vadd.f32 %v2251_v55, %v2250_v36  ;;  %v1942_v43 = vcombine.high %v1914_v59, %v1914_v59  ;;  %v1949_v44 = vrot.slane %v1914_v59, %v4963_v51  ;;  %v1941_v61 = vcombine.high %v1939_v45, %v1939_v45 }
 0x176   :  { %v2051_v15 = vsel %vm582_vm6, %v1932_v22, 0.0  ;;  %v2052_v21 = vsel %vm582_vm6, %v1940_v18, 0.0  ;;  %v2195_v33 = vcombine.high %v2187_v35, %v2187_v35  ;;  %v4257_v60 = vrot.slane %v2197_v32, %v4963_v51 }
 0x177   :  { %v2254_v9 = vadd.f32 %v2253_v54, %v2252_v50  ;;  %v2259_v53 = vsel %vm582_vm6, %v2162_v28, 0.0  ;;  %v2053_v13 = vadd.f32 %v2052_v21, %v2051_v15  ;;  %v2179_v14 = vcombine.high %v2177_v52, %v2177_v52 }
 0x178   :  { %v2212_v42 = vcombine.high %v4244_v23, %v4244_v23  ;;  %v2054_v16 = vsel %vm582_vm6, %v1939_v45, 0.0  ;;  %v2261_v4 = vsel %vm582_vm6, %v2170_v1, 0.0  ;;  %v4268_v19 = vsub.f32 %v3054_v40, %v4171_v27 }
 0x179   :  { %v2256_v0 = vadd.f32 %v2255_v7, %v2254_v9  ;;  %v1915_v63 = vmul.f32 %v4251_v34, %v4966_v48  ;;  %v2055_v46 = vadd.f32 %v2054_v16, %v2053_v13  ;;  %v1956_v30 = vrot.slane %v1942_v43, %v4963_v51 }
 0x17a   :  { %v1957_v49 = vcombine.high %v1949_v44, %v1949_v44  ;;  %v2056_v36 = vsel %vm582_vm6, %v1941_v61, 0.0  ;;  %v2196_v56 = vcombine.high %v2194_v11, %v2194_v11  ;;  %v2213_v26 = vcombine.high %v4257_v60, %v4257_v60 }
 0x17b   :  { %v2258_v12 = vadd.f32 %v2257_v58, %v2256_v0  ;;  %v2263_v38 = vsel %vm582_vm6, %v2178_v8, 0.0  ;;  %v2057_v55 = vadd.f32 %v2056_v36, %v2055_v46  ;;  %v2265_v27 = vsel %vm582_vm6, %v2177_v52, 0.0  ;;  %v4970_v8 = vld [vmem:[#allocation39_spill] sm:$0xff] }
 0x17c   :  { %v2267_v1 = vsel %vm582_vm6, %v2179_v14, 0.0  ;;  %v2058_v48 = vsel %vm582_vm6, %v1949_v44, 0.0  ;;  %v2269_v37 = vsel %vm582_vm6, %v2187_v35, 0.0  ;;  %v1916_v50 = vmul.f32 %v4268_v19, %v4967_v62  ;;  %v3055_v62 = vld [vmem:[%s4626_s0 + $0x20] sm:$0xff] }
 0x17d   :  { %v2260_v57 = vadd.f32 %v2259_v53, %v2258_v12  ;;  %v1959_v54 = vcombine.high %v1915_v63, %v1915_v63  ;;  %v2059_v59 = vadd.f32 %v2058_v48, %v2057_v55  ;;  %v1958_v9 = vcombine.high %v1956_v30, %v1956_v30 }
 0x17e   :  { %v1966_v45 = vrot.slane %v1915_v63, %v4963_v51  ;;  %v2060_v18 = vsel %vm582_vm6, %v1957_v49, 0.0  ;;  %v2271_v32 = vsel %vm582_vm6, %v2195_v33, 0.0  ;;  %v2273_v52 = vsel %vm582_vm6, %v2194_v11, 0.0  ;;  %v3056_v11 = vld [vmem:[%s4626_s0 + $0x28] sm:$0xff] }
 0x17f   :  { %v2262_v47 = vadd.f32 %v2261_v4, %v2260_v57  ;;  %v2061_v7 = vadd.f32 %v2060_v18, %v2059_v59  ;;  %v2476_v0 = vmul.f32 %v4149_v20, %v4970_v8  ;;  %v2275_v58 = vsel %vm582_vm6, %v2196_v56, 0.0  ;;  %v4971_v56 = vld [vmem:[#allocation48_spill] sm:$0xff] }
 0x180   :  { %v4294_v24 = vsub.f32 %v3055_v62, %v4184_v39  ;;  %v2062_v43 = vsel %vm582_vm6, %v1956_v30, 0.0  ;;  %v2277_v44 = vsel %vm582_vm6, %v4244_v23, 0.0  ;;  %v4303_v12 = vsub.f32 %v3056_v11, %v4190_v3 }
 0x181   :  { %v2264_v22 = vadd.f32 %v2263_v38, %v2262_v47  ;;  %v1976_v61 = vcombine.high %v1916_v50, %v1916_v50  ;;  %v2063_v15 = vadd.f32 %v2062_v43, %v2061_v7  ;;  %v1973_v33 = vrot.slane %v1959_v54, %v4963_v51 }
 0x182   :  { %v1974_v53 = vcombine.high %v1966_v45, %v1966_v45  ;;  %v2064_v39 = vsel %vm582_vm6, %v1958_v9, 0.0  ;;  %v2279_v13 = vsel %vm582_vm6, %v2212_v42, 0.0  ;;  %v2488_v57 = vcombine.high %v2476_v0, %v2476_v0 }
 0x183   :  { %v2266_v28 = vadd.f32 %v2265_v27, %v2264_v22  ;;  %v2065_v14 = vadd.f32 %v2064_v39, %v2063_v15  ;;  %v2495_v23 = vrot.slane %v2476_v0, %v4963_v51  ;;  %v1917_v4 = vmul.f32 %v4294_v24, %v4968_v29 }
 0x184   :  { %v1983_v3 = vrot.slane %v1916_v50, %v4963_v51  ;;  %v2066_v40 = vsel %vm582_vm6, %v1966_v45, 0.0  ;;  %v2281_v63 = vsel %vm582_vm6, %v4257_v60, 0.0  ;;  %v1918_v46 = vmul.f32 %v4303_v12, %v4969_v41 }
 0x185   :  { %v2268_v35 = vadd.f32 %v2267_v1, %v2266_v28  ;;  %v1990_v42 = vrot.slane %v1976_v61, %v4963_v51  ;;  %v2067_v47 = vadd.f32 %v2066_v40, %v2065_v14  ;;  %v1975_v49 = vcombine.high %v1973_v33, %v1973_v33 }
 0x186   :  { %v2068_v36 = vsel %vm582_vm6, %v1974_v53, 0.0  ;;  %v2477_v29 = vmul.f32 %v4154_v5, %v4971_v56  ;;  %v2283_v38 = vsel %vm582_vm6, %v2213_v26, 0.0  ;;  %v2502_v22 = vrot.slane %v2488_v57, %v4963_v51 }
 0x187   :  { %v2270_v21 = vadd.f32 %v2269_v37, %v2268_v35  ;;  %v2069_v55 = vadd.f32 %v2068_v36, %v2067_v47  ;;  %v2503_v27 = vcombine.high %v2495_v23, %v2495_v23  ;;  %v1991_v1 = vcombine.high %v1983_v3, %v1983_v3 }
 0x188   :  { %v1993_v48 = vcombine.high %v1917_v4, %v1917_v4  ;;  %v2070_v41 = vsel %vm582_vm6, %v1973_v33, 0.0  ;;  %v1992_v37 = vcombine.high %v1990_v42, %v1990_v42  ;;  %v2000_v50 = vrot.slane %v1917_v4, %v4963_v51  ;;  %v4972_v33 = vld [vmem:[#allocation55_spill] sm:$0xff] }
 0x189   :  { %v2272_v16 = vadd.f32 %v2271_v32, %v2270_v21  ;;  %v2010_v54 = vcombine.high %v1918_v46, %v1918_v46  ;;  %v2071_v59 = vadd.f32 %v2070_v41, %v2069_v55  ;;  %v2072_v9 = vsel %vm582_vm6, %v1975_v49, 0.0 }
 0x18a   :  { %v2505_v45 = vcombine.high %v2477_v29, %v2477_v29  ;;  %v2512_v26 = vrot.slane %v2477_v29, %v4963_v51  ;;  %v2504_v32 = vcombine.high %v2502_v22, %v2502_v22  ;;  %v2615_v7 = vsel %vm582_vm6, %v2503_v27, 0.0 }
 0x18b   :  { %v2274_v30 = vadd.f32 %v2273_v52, %v2272_v16  ;;  %v2073_v18 = vadd.f32 %v2072_v9, %v2071_v59  ;;  %v2614_v52 = vsel %vm582_vm6, %v2495_v23, 0.0  ;;  %v2007_v35 = vrot.slane %v1993_v48, %v4963_v51 }
 0x18c   :  { %v2616_v62 = vadd.f32 %v2615_v7, %v2614_v52  ;;  %v2017_v43 = vrot.slane %v1918_v46, %v4963_v51  ;;  %v2617_v61 = vsel %vm582_vm6, %v2502_v22, 0.0  ;;  %v2076_v21 = vsel %vm582_vm6, %v1991_v1, 0.0 }
 0x18d   :  { %v2276_v60 = vadd.f32 %v2275_v58, %v2274_v30  ;;  %v2074_v58 = vsel %vm582_vm6, %v1983_v3, 0.0  ;;  %v2478_v53 = vmul.f32 %v4176_v31, %v4972_v33  ;;  %v2519_v14 = vrot.slane %v2505_v45, %v4963_v51 }
 0x18e   :  { %v2075_v11 = vadd.f32 %v2074_v58, %v2073_v18  ;;  %v2618_v39 = vadd.f32 %v2617_v61, %v2616_v62  ;;  %v2520_v57 = vcombine.high %v2512_v26, %v2512_v26  ;;  %v2619_v23 = vsel %vm582_vm6, %v2504_v32, 0.0  ;;  %v4974_v18 = vld [vmem:[#allocation57_spill] sm:$0xff] }
 0x18f   :  { %v2278_v28 = vadd.f32 %v2277_v44, %v2276_v60  ;;  %v2024_v44 = vrot.slane %v2010_v54, %v4963_v51  ;;  %v2008_v4 = vcombine.high %v2000_v50, %v2000_v50  ;;  %v2078_v3 = vsel %vm582_vm6, %v1990_v42, 0.0 }
 0x190   :  { %v2620_v40 = vadd.f32 %v2619_v23, %v2618_v39  ;;  %v2009_v46 = vcombine.high %v2007_v35, %v2007_v35  ;;  %v2025_v47 = vcombine.high %v2017_v43, %v2017_v43  ;;  %v2621_v30 = vsel %vm582_vm6, %v2512_v26, 0.0 }
 0x191   :  { %v2280_v0 = vadd.f32 %v2279_v13, %v2278_v28  ;;  %v2077_v13 = vadd.f32 %v2076_v21, %v2075_v11  ;;  %v2026_v49 = vcombine.high %v2024_v44, %v2024_v44  ;;  %v2080_v36 = vsel %vm582_vm6, %v1992_v37, 0.0  ;;  %v4973_v37 = vld [vmem:[#allocation56_spill] sm:$0xff] }
 0x192   :  { %v2522_v29 = vcombine.high %v2478_v53, %v2478_v53  ;;  %v2622_v55 = vadd.f32 %v2621_v30, %v2620_v40  ;;  %v2521_v27 = vcombine.high %v2519_v14, %v2519_v14  ;;  %v2529_v60 = vrot.slane %v2478_v53, %v4963_v51  ;;  %v4975_v53 = vld [vmem:[#allocation58_spill] sm:$0xff] }
 0x193   :  { %v2282_v15 = vadd.f32 %v2281_v63, %v2280_v0  ;;  %v2079_v63 = vadd.f32 %v2078_v3, %v2077_v13  ;;  %v2082_v42 = vsel %vm582_vm6, %v2000_v50, 0.0  ;;  %v2084_v1 = vsel %vm582_vm6, %v2008_v4, 0.0 }
 0x194   :  { %v2289_v41 = vmul.f32 %v4208_v25, %v4970_v8  ;;  %v2086_v59 = vsel %vm582_vm6, %v2007_v35, 0.0  ;;  %v2479_v28 = vmul.f32 %v4198_v2, %v4973_v37  ;;  %v2625_v9 = vsel %vm582_vm6, %v2519_v14, 0.0 }
 0x195   :  { %v2284_v16 = vadd.f32 %v2283_v38, %v2282_v15  ;;  %v2081_v22 = vadd.f32 %v2080_v36, %v2079_v63  ;;  %v2623_v38 = vsel %vm582_vm6, %v2520_v57, 0.0  ;;  %v2088_v45 = vsel %vm582_vm6, %v2009_v46, 0.0 }
 0x196   :  { %v2624_v48 = vadd.f32 %v2623_v38, %v2622_v55  ;;  %v2090_v26 = vsel %vm582_vm6, %v2017_v43, 0.0  ;;  %v2480_v50 = vmul.f32 %v4203_v17, %v4974_v18  ;;  %v2536_v7 = vrot.slane %v2522_v29, %v4963_v51 }
 0x197   :  { %2285 = vadd.xlane.f32.xlu0 %v2284_v16  ;;  %v2083_v54 = vadd.f32 %v2082_v42, %v2081_v22  ;;  %v2537_v8 = vcombine.high %v2529_v60, %v2529_v60  ;;  %v2627_v0 = vsel %vm582_vm6, %v2521_v27, 0.0  ;;  %v2092_v35 = vsel %vm582_vm6, %v2025_v47, 0.0 }
 0x198   :  { %v2626_v32 = vadd.f32 %v2625_v9, %v2624_v48  ;;  %v2301_v62 = vcombine.high %v2289_v41, %v2289_v41  ;;  %v2308_v11 = vrot.slane %v2289_v41, %v4963_v51  ;;  %v2094_v15 = vsel %vm582_vm6, %v2024_v44, 0.0 }
 0x199   :  { %v2085_v52 = vadd.f32 %v2084_v1, %v2083_v54  ;;  %v2539_v43 = vcombine.high %v2479_v28, %v2479_v28  ;;  %v2629_v21 = vsel %vm582_vm6, %v2529_v60, 0.0  ;;  %v2481_v39 = vmul.f32 %v4212_v10, %v4975_v53 }
 0x19a   :  { %v2628_v58 = vadd.f32 %v2627_v0, %v2626_v32  ;;  %v2546_v13 = vrot.slane %v2479_v28, %v4963_v51  ;;  %v2556_v14 = vcombine.high %v2480_v50, %v2480_v50  ;;  %v2538_v16 = vcombine.high %v2536_v7, %v2536_v7 }
 0x19b   :  { %v2087_v61 = vadd.f32 %v2086_v59, %v2085_v52  ;;  %v2631_v4 = vsel %vm582_vm6, %v2537_v8, 0.0  ;;  %v2290_v3 = vmul.f32 %v4227_v6, %v4971_v56  ;;  %v2096_v40 = vsel %vm582_vm6, %v2026_v49, 0.0 }
 0x19c   :  { %v2630_v57 = vadd.f32 %v2629_v21, %v2628_v58  ;;  %v2315_v46 = vrot.slane %v2301_v62, %v4963_v51  ;;  %v2316_v47 = vcombine.high %v2308_v11, %v2308_v11  ;;  %v2553_v30 = vrot.slane %v2539_v43, %v4963_v51 }
 0x19d   :  { %v2089_v23 = vadd.f32 %v2088_v45, %v2087_v61  ;;  %v2563_v36 = vrot.slane %v2480_v50, %v4963_v51  ;;  %v2633_v29 = vsel %vm582_vm6, %v2536_v7, 0.0  ;;  %v2554_v55 = vcombine.high %v2546_v13, %v2546_v13 }
 0x19e   :  { %v2632_v44 = vadd.f32 %v2631_v4, %v2630_v57  ;;  %v2570_v22 = vrot.slane %v2556_v14, %v4963_v51  ;;  %v2573_v27 = vcombine.high %v2481_v39, %v2481_v39  ;;  %v2635_v56 = vsel %vm582_vm6, %v2538_v16, 0.0 }
 0x19f   :  { %v2091_v63 = vadd.f32 %v2090_v26, %v2089_v23  ;;  %v2318_v49 = vcombine.high %v2290_v3, %v2290_v3  ;;  %v2325_v42 = vrot.slane %v2290_v3, %v4963_v51  ;;  %v2317_v48 = vcombine.high %v2315_v46, %v2315_v46 }
 0x1a0   :  { %v2634_v60 = vadd.f32 %v2633_v29, %v2632_v44  ;;  %v2427_v41 = vsel %vm582_vm6, %v2308_v11, 0.0  ;;  %v2428_v54 = vsel %vm582_vm6, %v2316_v47, 0.0  ;;  %v2580_v28 = vrot.slane %v2481_v39, %v4963_v51  ;;  %v4976_v47 = vld [vmem:[#allocation71_spill] sm:$0xff] }
 0x1a1   :  { %v2093_v38 = vadd.f32 %v2092_v35, %v2091_v63  ;;  %v2637_v9 = vsel %vm582_vm6, %v2546_v13, 0.0  ;;  %v2429_v45 = vadd.f32 %v2428_v54, %v2427_v41  ;;  %v2555_v26 = vcombine.high %v2553_v30, %v2553_v30 }
 0x1a2   :  { %v2636_v1 = vadd.f32 %v2635_v56, %v2634_v60  ;;  %v2587_v50 = vrot.slane %v2573_v27, %v4963_v51  ;;  %v2430_v52 = vsel %vm582_vm6, %v2315_v46, 0.0  ;;  %v2639_v8 = vsel %vm582_vm6, %v2554_v55, 0.0 }
 0x1a3   :  { %v2095_v59 = vadd.f32 %v2094_v15, %v2093_v38  ;;  %v2291_v0 = vmul.f32 %v4251_v34, %v4972_v33  ;;  %v2431_v35 = vadd.f32 %v2430_v52, %v2429_v45  ;;  %v2332_v62 = vrot.slane %v2318_v49, %v4963_v51 }
 0x1a4   :  { %v2638_v32 = vadd.f32 %v2637_v9, %v2636_v1  ;;  %v2333_v11 = vcombine.high %v2325_v42, %v2325_v42  ;;  %v2432_v61 = vsel %vm582_vm6, %v2317_v48, 0.0  ;;  %v2571_v15 = vcombine.high %v2563_v36, %v2563_v36 }
 0x1a5   :  { %v2097_v7 = vadd.f32 %v2096_v40, %v2095_v59  ;;  %v2572_v43 = vcombine.high %v2570_v22, %v2570_v22  ;;  %v2641_v21 = vsel %vm582_vm6, %v2553_v30, 0.0  ;;  %v2433_v39 = vadd.f32 %v2432_v61, %v2431_v35 }
 0x1a6   :  { %v2640_v58 = vadd.f32 %v2639_v8, %v2638_v32  ;;  %v2588_v13 = vcombine.high %v2580_v28, %v2580_v28  ;;  %v2589_v14 = vcombine.high %v2587_v50, %v2587_v50  ;;  %v2434_v23 = vsel %vm582_vm6, %v2325_v42, 0.0 }
 0x1a7   :  { %2098 = vadd.xlane.f32.xlu1 %v2097_v7  ;;  %v2643_v33 = vsel %vm582_vm6, %v2555_v26, 0.0  ;;  %v2335_v16 = vcombine.high %v2291_v0, %v2291_v0  ;;  %v2342_v4 = vrot.slane %v2291_v0, %v4963_v51  ;;  %v2435_v3 = vadd.f32 %v2434_v23, %v2433_v39 }
 0x1a8   :  { %v2642_v57 = vadd.f32 %v2641_v21, %v2640_v58  ;;  %v2334_v44 = vcombine.high %v2332_v62, %v2332_v62  ;;  %v2436_v46 = vsel %vm582_vm6, %v2333_v11, 0.0  ;;  %v2852_v63 = vmul.f32 %v4149_v20, %v4976_v47  ;;  %v4977_v58 = vld [vmem:[#allocation72_spill] sm:$0xff] }
 0x1a9   :  { %v2645_v30 = vsel %vm582_vm6, %v2563_v36, 0.0  ;;  %v2647_v29 = vsel %vm582_vm6, %v2571_v15, 0.0  ;;  %v2292_v55 = vmul.f32 %v4268_v19, %v4973_v37  ;;  %v2437_v27 = vadd.f32 %v2436_v46, %v2435_v3 }
 0x1aa   :  { %v2644_v40 = vadd.f32 %v2643_v33, %v2642_v57  ;;  %v2649_v38 = vsel %vm582_vm6, %v2570_v22, 0.0  ;;  %v2651_v56 = vsel %vm582_vm6, %v2572_v43, 0.0  ;;  %v2438_v49 = vsel %vm582_vm6, %v2332_v62, 0.0 }
 0x1ab   :  { %v2653_v42 = vsel %vm582_vm6, %v2580_v28, 0.0  ;;  %v2349_v1 = vrot.slane %v2335_v16, %v4963_v51  ;;  %v2350_v48 = vcombine.high %v2342_v4, %v2342_v4  ;;  %v2439_v41 = vadd.f32 %v2438_v49, %v2437_v27 }
 0x1ac   :  { %v2646_v60 = vadd.f32 %v2645_v30, %v2644_v40  ;;  %v2440_v54 = vsel %vm582_vm6, %v2334_v44, 0.0  ;;  %v2864_v59 = vcombine.high %v2852_v63, %v2852_v63  ;;  %v2871_v37 = vrot.slane %v2852_v63, %v4963_v51 }
 0x1ad   :  { %v2655_v9 = vsel %vm582_vm6, %v2588_v13, 0.0  ;;  %v2293_v22 = vmul.f32 %v4294_v24, %v4974_v18  ;;  %v2352_v45 = vcombine.high %v2292_v55, %v2292_v55  ;;  %v2441_v26 = vadd.f32 %v2440_v54, %v2439_v41 }
 0x1ae   :  { %v2648_v36 = vadd.f32 %v2647_v29, %v2646_v60  ;;  %v2657_v28 = vsel %vm582_vm6, %v2587_v50, 0.0  ;;  %v2359_v52 = vrot.slane %v2292_v55, %v4963_v51  ;;  %v2442_v7 = vsel %vm582_vm6, %v2342_v4, 0.0 }
 0x1af   :  { %v2659_v8 = vsel %vm582_vm6, %v2589_v14, 0.0  ;;  %v2351_v0 = vcombine.high %v2349_v1, %v2349_v1  ;;  %v2443_v35 = vadd.f32 %v2442_v7, %v2441_v26  ;;  %v2853_v62 = vmul.f32 %v4154_v5, %v4977_v58 }
 0x1b0   :  { %v2650_v32 = vadd.f32 %v2649_v38, %v2648_v36  ;;  %v2444_v61 = vsel %vm582_vm6, %v2350_v48, 0.0  ;;  %v2878_v18 = vrot.slane %v2864_v59, %v4963_v51  ;;  %v2879_v15 = vcombine.high %v2871_v37, %v2871_v37 }
 0x1b1   :  { %v2294_v50 = vmul.f32 %v4303_v12, %v4975_v53  ;;  %v2366_v43 = vrot.slane %v2352_v45, %v4963_v51  ;;  %v2369_v21 = vcombine.high %v2293_v22, %v2293_v22  ;;  %v2445_v39 = vadd.f32 %v2444_v61, %v2443_v35 }
 0x1b2   :  { %v2652_v11 = vadd.f32 %v2651_v56, %v2650_v32  ;;  %v2367_v14 = vcombine.high %v2359_v52, %v2359_v52  ;;  %v2376_v57 = vrot.slane %v2293_v22, %v4963_v51  ;;  %v2446_v23 = vsel %vm582_vm6, %v2349_v1, 0.0  ;;  %v4978_v1 = vld [vmem:[#allocation77_spill] sm:$0xff] }
 0x1b3   :  { %v2447_v33 = vadd.f32 %v2446_v23, %v2445_v39  ;;  %v2448_v16 = vsel %vm582_vm6, %v2351_v0, 0.0  ;;  %v2881_v4 = vcombine.high %v2853_v62, %v2853_v62  ;;  %v2888_v3 = vrot.slane %v2853_v62, %v4963_v51 }
 0x1b4   :  { %v2654_v13 = vadd.f32 %v2653_v42, %v2652_v11  ;;  %v2880_v44 = vcombine.high %v2878_v18, %v2878_v18  ;;  %v2990_v53 = vsel %vm582_vm6, %v2871_v37, 0.0  ;;  %v2991_v46 = vsel %vm582_vm6, %v2879_v15, 0.0 }
 0x1b5   :  { %v2383_v63 = vrot.slane %v2369_v21, %v4963_v51  ;;  %v2386_v30 = vcombine.high %v2294_v50, %v2294_v50  ;;  %v2449_v29 = vadd.f32 %v2448_v16, %v2447_v33  ;;  %v2992_v55 = vadd.f32 %v2991_v46, %v2990_v53 }
 0x1b6   :  { %v2656_v40 = vadd.f32 %v2655_v9, %v2654_v13  ;;  %v2368_v60 = vcombine.high %v2366_v43, %v2366_v43  ;;  %v2450_v38 = vsel %vm582_vm6, %v2359_v52, 0.0  ;;  %v2993_v56 = vsel %vm582_vm6, %v2878_v18, 0.0 }
 0x1b7   :  { %v2451_v49 = vadd.f32 %v2450_v38, %v2449_v29  ;;  %v2452_v42 = vsel %vm582_vm6, %v2367_v14, 0.0  ;;  %v2854_v48 = vmul.f32 %v4176_v31, %v4978_v1  ;;  %v2994_v41 = vadd.f32 %v2993_v56, %v2992_v55 }
 0x1b8   :  { %v2658_v27 = vadd.f32 %v2657_v28, %v2656_v40  ;;  %v2895_v54 = vrot.slane %v2881_v4, %v4963_v51  ;;  %v2896_v59 = vcombine.high %v2888_v3, %v2888_v3  ;;  %v2995_v37 = vsel %vm582_vm6, %v2880_v44, 0.0  ;;  %v4979_v4 = vld [vmem:[#allocation82_spill] sm:$0xff] }
 0x1b9   :  { %v2393_v9 = vrot.slane %v2294_v50, %v4963_v51  ;;  %v2453_v22 = vadd.f32 %v2452_v42, %v2451_v49  ;;  %v2996_v45 = vadd.f32 %v2995_v37, %v2994_v41  ;;  %v2384_v26 = vcombine.high %v2376_v57, %v2376_v57 }
 0x1ba   :  { %v2660_v36 = vadd.f32 %v2659_v8, %v2658_v27  ;;  %v2400_v32 = vrot.slane %v2386_v30, %v4963_v51  ;;  %v2454_v28 = vsel %vm582_vm6, %v2366_v43, 0.0  ;;  %v2997_v52 = vsel %vm582_vm6, %v2888_v3, 0.0 }
 0x1bb   :  { %v2385_v7 = vcombine.high %v2383_v63, %v2383_v63  ;;  %v2455_v0 = vadd.f32 %v2454_v28, %v2453_v22  ;;  %v2456_v8 = vsel %vm582_vm6, %v2368_v60, 0.0  ;;  %v2998_v35 = vadd.f32 %v2997_v52, %v2996_v45  ;;  %v4980_v60 = vld [vmem:[#allocation87_spill] sm:$0xff]  ;;  %v4981_v52 = vld [vmem:[#allocation88_spill] sm:$0xff] }
 0x1bc   :  { %2661 = vadd.xlane.f32.xlu0 %v2660_v36  ;;  %v2897_v62 = vcombine.high %v2895_v54, %v2895_v54  ;;  %v2898_v11 = vcombine.high %v2854_v48, %v2854_v48  ;;  %v2905_v61 = vrot.slane %v2854_v48, %v4963_v51  ;;  %v2999_v18 = vsel %vm582_vm6, %v2896_v59, 0.0 }
 0x1bd   :  { %v2401_v15 = vcombine.high %v2393_v9, %v2393_v9  ;;  %v2457_v50 = vadd.f32 %v2456_v8, %v2455_v0  ;;  %v3000_v21 = vadd.f32 %v2999_v18, %v2998_v35  ;;  %v2665_v39 = vmul.f32 %v4208_v25, %v4976_v47 }
 0x1be   :  { %v2402_v43 = vcombine.high %v2400_v32, %v2400_v32  ;;  %v2458_v13 = vsel %vm582_vm6, %v2376_v57, 0.0  ;;  %v2460_v14 = vsel %vm582_vm6, %v2384_v26, 0.0  ;;  %v3001_v23 = vsel %vm582_vm6, %v2895_v54, 0.0 }
 0x1bf   :  { %v2459_v33 = vadd.f32 %v2458_v13, %v2457_v50  ;;  %v2462_v16 = vsel %vm582_vm6, %v2383_v63, 0.0  ;;  %v2855_v3 = vmul.f32 %v4198_v2, %v4979_v4  ;;  %v3002_v40 = vadd.f32 %v3001_v23, %v3000_v21 }
 0x1c0   :  { %v2912_v44 = vrot.slane %v2898_v11, %v4963_v51  ;;  %v2913_v53 = vcombine.high %v2905_v61, %v2905_v61  ;;  %v3003_v46 = vsel %vm582_vm6, %v2897_v62, 0.0  ;;  %v2677_v47 = vcombine.high %v2665_v39, %v2665_v39 }
 0x1c1   :  { %v2461_v30 = vadd.f32 %v2460_v14, %v2459_v33  ;;  %v2464_v57 = vsel %vm582_vm6, %v2385_v7, 0.0  ;;  %v3004_v29 = vadd.f32 %v3003_v46, %v3002_v40  ;;  %v2684_v55 = vrot.slane %v2665_v39, %v4963_v51 }
 0x1c2   :  { %v2466_v27 = vsel %vm582_vm6, %v2393_v9, 0.0  ;;  %v2468_v63 = vsel %vm582_vm6, %v2401_v15, 0.0  ;;  %v2856_v38 = vmul.f32 %v4203_v17, %v4980_v60  ;;  %v3005_v56 = vsel %vm582_vm6, %v2905_v61, 0.0 }
 0x1c3   :  { %v2463_v49 = vadd.f32 %v2462_v16, %v2461_v30  ;;  %v2915_v42 = vcombine.high %v2855_v3, %v2855_v3  ;;  %v2922_v48 = vrot.slane %v2855_v3, %v4963_v51  ;;  %v3006_v41 = vadd.f32 %v3005_v56, %v3004_v29 }
 0x1c4   :  { %v2914_v36 = vcombine.high %v2912_v44, %v2912_v44  ;;  %v3007_v54 = vsel %vm582_vm6, %v2913_v53, 0.0  ;;  %v2666_v59 = vmul.f32 %v4227_v6, %v4977_v58  ;;  %v2691_v37 = vrot.slane %v2677_v47, %v4963_v51 }
 0x1c5   :  { %v2465_v9 = vadd.f32 %v2464_v57, %v2463_v49  ;;  %v2470_v22 = vsel %vm582_vm6, %v2400_v32, 0.0  ;;  %v3008_v45 = vadd.f32 %v3007_v54, %v3006_v41  ;;  %v2692_v26 = vcombine.high %v2684_v55, %v2684_v55 }
 0x1c6   :  { %v2472_v28 = vsel %vm582_vm6, %v2402_v43, 0.0  ;;  %v2857_v7 = vmul.f32 %v4212_v10, %v4981_v52  ;;  %v2932_v0 = vcombine.high %v2856_v38, %v2856_v38  ;;  %v3009_v8 = vsel %vm582_vm6, %v2912_v44, 0.0 }
 0x1c7   :  { %v2467_v35 = vadd.f32 %v2466_v27, %v2465_v9  ;;  %v2929_v62 = vrot.slane %v2915_v42, %v4963_v51  ;;  %v2930_v11 = vcombine.high %v2922_v48, %v2922_v48  ;;  %v3010_v58 = vadd.f32 %v3009_v8, %v3008_v45 }
 0x1c8   :  { %v3011_v61 = vsel %vm582_vm6, %v2914_v36, 0.0  ;;  %v2693_v18 = vcombine.high %v2691_v37, %v2691_v37  ;;  %v2694_v15 = vcombine.high %v2666_v59, %v2666_v59  ;;  %v2701_v32 = vrot.slane %v2666_v59, %v4963_v51 }
 0x1c9   :  { %v2469_v50 = vadd.f32 %v2468_v63, %v2467_v35  ;;  %v3012_v21 = vadd.f32 %v3011_v61, %v3010_v58  ;;  %v2803_v39 = vsel %vm582_vm6, %v2684_v55, 0.0  ;;  %v2804_v43 = vsel %vm582_vm6, %v2692_v26, 0.0 }
 0x1ca   :  { %v2939_v13 = vrot.slane %v2856_v38, %v4963_v51  ;;  %v2949_v14 = vcombine.high %v2857_v7, %v2857_v7  ;;  %v3013_v23 = vsel %vm582_vm6, %v2922_v48, 0.0  ;;  %v2805_v33 = vadd.f32 %v2804_v43, %v2803_v39 }
 0x1cb   :  { %v2471_v16 = vadd.f32 %v2470_v22, %v2469_v50  ;;  %v2931_v3 = vcombine.high %v2929_v62, %v2929_v62  ;;  %v3014_v40 = vadd.f32 %v3013_v23, %v3012_v21  ;;  %v2806_v44 = vsel %vm582_vm6, %v2691_v37, 0.0 }
 0x1cc   :  { %v3015_v53 = vsel %vm582_vm6, %v2930_v11, 0.0  ;;  %v2667_v46 = vmul.f32 %v4251_v34, %v4978_v1  ;;  %v2708_v47 = vrot.slane %v2694_v15, %v4963_v51  ;;  %v2807_v30 = vadd.f32 %v2806_v44, %v2805_v33 }
 0x1cd   :  { %v2473_v57 = vadd.f32 %v2472_v28, %v2471_v16  ;;  %v3016_v29 = vadd.f32 %v3015_v53, %v3014_v40  ;;  %v2709_v55 = vcombine.high %v2701_v32, %v2701_v32  ;;  %v2808_v27 = vsel %vm582_vm6, %v2693_v18, 0.0 }
 0x1ce   :  { %v2946_v63 = vrot.slane %v2932_v0, %v4963_v51  ;;  %v3017_v38 = vsel %vm582_vm6, %v2929_v62, 0.0  ;;  %v2809_v56 = vadd.f32 %v2808_v27, %v2807_v30  ;;  %v2947_v49 = vcombine.high %v2939_v13, %v2939_v13 }
 0x1cf   :  { %2474 = vadd.xlane.f32.xlu1 %v2473_v57  ;;  %v2956_v42 = vrot.slane %v2857_v7, %v4963_v51  ;;  %v3018_v48 = vadd.f32 %v3017_v38, %v3016_v29  ;;  %v2810_v1 = vsel %vm582_vm6, %v2701_v32, 0.0  ;;  %v2963_v41 = vrot.slane %v2949_v14, %v4963_v51 }
 0x1d0   :  { %v3019_v36 = vsel %vm582_vm6, %v2931_v3, 0.0  ;;  %v2711_v54 = vcombine.high %v2667_v46, %v2667_v46  ;;  %v2811_v59 = vadd.f32 %v2810_v1, %v2809_v56  ;;  %v2710_v9 = vcombine.high %v2708_v47, %v2708_v47 }
 0x1d1   :  { %v3020_v37 = vadd.f32 %v3019_v36, %v3018_v48  ;;  %v2718_v22 = vrot.slane %v2667_v46, %v4963_v51  ;;  %v2812_v45 = vsel %vm582_vm6, %v2709_v55, 0.0  ;;  %v3021_v26 = vsel %vm582_vm6, %v2939_v13, 0.0 }
 0x1d2   :  { %v2813_v28 = vadd.f32 %v2812_v45, %v2811_v59  ;;  %v1725_v7 = vmul.f32 %v4149_v20, %v4149_v20  ;;  %v2948_v0 = vcombine.high %v2946_v63, %v2946_v63  ;;  %v2964_v8 = vcombine.high %v2956_v42, %v2956_v42 }
 0x1d3   :  { %v3022_v35 = vadd.f32 %v3021_v26, %v3020_v37  ;;  %v2814_v62 = vsel %vm582_vm6, %v2708_v47, 0.0  ;;  %v2965_v11 = vcombine.high %v2963_v41, %v2963_v41  ;;  %v3023_v58 = vsel %vm582_vm6, %v2947_v49, 0.0 }
 0x1d4   :  { %v2668_v61 = vmul.f32 %v4268_v19, %v4979_v4  ;;  %v2815_v18 = vadd.f32 %v2814_v62, %v2813_v28  ;;  %v2725_v32 = vrot.slane %v2711_v54, %v4963_v51  ;;  %v2726_v50 = vcombine.high %v2718_v22, %v2718_v22 }
 0x1d5   :  { %v3024_v15 = vadd.f32 %v3023_v58, %v3022_v35  ;;  %v2816_v21 = vsel %vm582_vm6, %v2710_v9, 0.0  ;;  %v3025_v20 = vsel %vm582_vm6, %v2946_v63, 0.0  ;;  %v1737_v43 = vcombine.high %v1725_v7, %v1725_v7 }
 0x1d6   :  { %v2817_v39 = vadd.f32 %v2816_v21, %v2815_v18  ;;  %v1744_v13 = vrot.slane %v1725_v7, %v4963_v51  ;;  %v3027_v23 = vsel %vm582_vm6, %v2948_v0, 0.0  ;;  %v3029_v33 = vsel %vm582_vm6, %v2956_v42, 0.0 }
 0x1d7   :  { %v3026_v14 = vadd.f32 %v3025_v20, %v3024_v15  ;;  %v2818_v4 = vsel %vm582_vm6, %v2718_v22, 0.0  ;;  %v3031_v16 = vsel %vm582_vm6, %v2964_v8, 0.0  ;;  %v2728_v3 = vcombine.high %v2668_v61, %v2668_v61 }
 0x1d8   :  { %v2735_v40 = vrot.slane %v2668_v61, %v4963_v51  ;;  %v2819_v44 = vadd.f32 %v2818_v4, %v2817_v39  ;;  %v2727_v46 = vcombine.high %v2725_v32, %v2725_v32  ;;  %v2820_v47 = vsel %vm582_vm6, %v2726_v50, 0.0 }
 0x1d9   :  { %v3028_v53 = vadd.f32 %v3027_v23, %v3026_v14  ;;  %v1726_v30 = vmul.f32 %v4154_v5, %v4154_v5  ;;  %v3033_v57 = vsel %vm582_vm6, %v2963_v41, 0.0  ;;  %v1751_v55 = vrot.slane %v1737_v43, %v4963_v51 }
 0x1da   :  { %v2821_v29 = vadd.f32 %v2820_v47, %v2819_v44  ;;  %v1752_v27 = vcombine.high %v1744_v13, %v1744_v13  ;;  %v3035_v38 = vsel %vm582_vm6, %v2965_v11, 0.0  ;;  %v2669_v56 = vmul.f32 %v4294_v24, %v4980_v60 }
 0x1db   :  { %v3030_v63 = vadd.f32 %v3029_v33, %v3028_v53  ;;  %v2822_v49 = vsel %vm582_vm6, %v2725_v32, 0.0  ;;  %v2670_v42 = vmul.f32 %v4303_v12, %v4981_v52  ;;  %v2742_v48 = vrot.slane %v2728_v3, %v4963_v51 }
 0x1dc   :  { %v2743_v5 = vcombine.high %v2735_v40, %v2735_v40  ;;  %v2823_v1 = vadd.f32 %v2822_v49, %v2821_v29  ;;  %v2824_v36 = vsel %vm582_vm6, %v2727_v46, 0.0  ;;  %v1754_v54 = vcombine.high %v1726_v30, %v1726_v30 }
 0x1dd   :  { %v3032_v41 = vadd.f32 %v3031_v16, %v3030_v63  ;;  %v1761_v59 = vrot.slane %v1726_v30, %v4963_v51  ;;  %v1753_v9 = vcombine.high %v1751_v55, %v1751_v55  ;;  %v1863_v22 = vsel %vm582_vm6, %v1744_v13, 0.0 }
 0x1de   :  { %v2825_v37 = vadd.f32 %v2824_v36, %v2823_v1  ;;  %v1864_v60 = vsel %vm582_vm6, %v1752_v27, 0.0  ;;  %v2745_v26 = vcombine.high %v2669_v56, %v2669_v56  ;;  %v2826_v52 = vsel %vm582_vm6, %v2735_v40, 0.0 }
 0x1df   :  { %v3034_v45 = vadd.f32 %v3033_v57, %v3032_v41  ;;  %v1865_v28 = vadd.f32 %v1864_v60, %v1863_v22  ;;  %v2744_v7 = vcombine.high %v2742_v48, %v2742_v48  ;;  %v2752_v0 = vrot.slane %v2669_v56, %v4963_v51 }
 0x1e0   :  { %v2827_v8 = vadd.f32 %v2826_v52, %v2825_v37  ;;  %v1866_v35 = vsel %vm582_vm6, %v1751_v55, 0.0  ;;  %v2828_v11 = vsel %vm582_vm6, %v2743_v5, 0.0  ;;  %v1727_v58 = vmul.f32 %v4176_v31, %v4176_v31 }
 0x1e1   :  { %v3036_v62 = vadd.f32 %v3035_v38, %v3034_v45  ;;  %v1867_v61 = vadd.f32 %v1866_v35, %v1865_v28  ;;  %v1768_v15 = vrot.slane %v1754_v54, %v4963_v51  ;;  %v1769_v32 = vcombine.high %v1761_v59, %v1761_v59 }
 0x1e2   :  { %v2829_v18 = vadd.f32 %v2828_v11, %v2827_v8  ;;  %v1868_v50 = vsel %vm582_vm6, %v1753_v9, 0.0  ;;  %v2762_v21 = vcombine.high %v2670_v42, %v2670_v42  ;;  %v2830_v20 = vsel %vm582_vm6, %v2742_v48, 0.0 }
 0x1e3   :  { %3037 = vadd.xlane.f32.xlu0 %v3036_v62  ;;  %v1869_v39 = vadd.f32 %v1868_v50, %v1867_v61  ;;  %v2759_v43 = vrot.slane %v2745_v26, %v4963_v51  ;;  %v2769_v13 = vrot.slane %v2670_v42, %v4963_v51  ;;  %v1870_v23 = vsel %vm582_vm6, %v1761_v59, 0.0 }
 0x1e4   :  { %v2831_v14 = vadd.f32 %v2830_v20, %v2829_v18  ;;  %v2760_v31 = vcombine.high %v2752_v0, %v2752_v0  ;;  %v2832_v33 = vsel %vm582_vm6, %v2744_v7, 0.0  ;;  %v1771_v4 = vcombine.high %v1727_v58, %v1727_v58 }
 0x1e5   :  { %v1871_v16 = vadd.f32 %v1870_v23, %v1869_v39  ;;  %v1770_v40 = vcombine.high %v1768_v15, %v1768_v15  ;;  %v1778_v44 = vrot.slane %v1727_v58, %v4963_v51  ;;  %v1872_v53 = vsel %vm582_vm6, %v1769_v32, 0.0 }
 0x1e6   :  { %v2833_v3 = vadd.f32 %v2832_v33, %v2831_v14  ;;  %v2834_v46 = vsel %vm582_vm6, %v2752_v0, 0.0  ;;  %v1538_v30 = vmul.f32 %v4208_v25, %v4208_v25  ;;  %v2761_v57 = vcombine.high %v2759_v43, %v2759_v43 }
 0x1e7   :  { %v1873_v47 = vadd.f32 %v1872_v53, %v1871_v16  ;;  %v2776_v29 = vrot.slane %v2762_v21, %v4963_v51  ;;  %v1874_v27 = vsel %vm582_vm6, %v1768_v15, 0.0  ;;  %v2777_v63 = vcombine.high %v2769_v13, %v2769_v13 }
 0x1e8   :  { %v2835_v55 = vadd.f32 %v2834_v46, %v2833_v3  ;;  %v2836_v38 = vsel %vm582_vm6, %v2760_v31, 0.0  ;;  %v1728_v56 = vmul.f32 %v4198_v2, %v4198_v2  ;;  %v1785_v48 = vrot.slane %v1771_v4, %v4963_v51 }
 0x1e9   :  { %v1875_v49 = vadd.f32 %v1874_v27, %v1873_v47  ;;  %v1786_v5 = vcombine.high %v1778_v44, %v1778_v44  ;;  %v1876_v1 = vsel %vm582_vm6, %v1770_v40, 0.0  ;;  %v2838_v25 = vsel %vm582_vm6, %v2759_v43, 0.0 }
 0x1ea   :  { %v2837_v42 = vadd.f32 %v2836_v38, %v2835_v55  ;;  %v1550_v36 = vcombine.high %v1538_v30, %v1538_v30  ;;  %v1557_v54 = vrot.slane %v1538_v30, %v4963_v51  ;;  %v2778_v59 = vcombine.high %v2776_v29, %v2776_v29 }
 0x1eb   :  { %v1877_v41 = vadd.f32 %v1876_v1, %v1875_v49  ;;  %v2840_v9 = vsel %vm582_vm6, %v2761_v57, 0.0  ;;  %v1878_v22 = vsel %vm582_vm6, %v1778_v44, 0.0  ;;  %v2842_v2 = vsel %vm582_vm6, %v2769_v13, 0.0 }
 0x1ec   :  { %v2839_v37 = vadd.f32 %v2838_v25, %v2837_v42  ;;  %v1788_v60 = vcombine.high %v1728_v56, %v1728_v56  ;;  %v1795_v45 = vrot.slane %v1728_v56, %v4963_v51  ;;  %v1787_v28 = vcombine.high %v1785_v48, %v1785_v48 }
 0x1ed   :  { %v1879_v26 = vadd.f32 %v1878_v22, %v1877_v41  ;;  %v1880_v7 = vsel %vm582_vm6, %v1786_v5, 0.0  ;;  %v1539_v0 = vmul.f32 %v4227_v6, %v4227_v6  ;;  %v2844_v8 = vsel %vm582_vm6, %v2777_v63, 0.0 }
 0x1ee   :  { %v2841_v52 = vadd.f32 %v2840_v9, %v2839_v37  ;;  %v1564_v62 = vrot.slane %v1550_v36, %v4963_v51  ;;  %v1565_v11 = vcombine.high %v1557_v54, %v1557_v54  ;;  %v2846_v61 = vsel %vm582_vm6, %v2776_v29, 0.0 }
 0x1ef   :  { %v1881_v35 = vadd.f32 %v1880_v7, %v1879_v26  ;;  %v1729_v18 = vmul.f32 %v4203_v17, %v4203_v17  ;;  %v1882_v15 = vsel %vm582_vm6, %v1785_v48, 0.0  ;;  %v2848_v32 = vsel %vm582_vm6, %v2778_v59, 0.0 }
 0x1f0   :  { %v2843_v58 = vadd.f32 %v2842_v2, %v2841_v52  ;;  %v1802_v50 = vrot.slane %v1788_v60, %v4963_v51  ;;  %v1803_v21 = vcombine.high %v1795_v45, %v1795_v45  ;;  %v1884_v39 = vsel %vm582_vm6, %v1787_v28, 0.0 }
 0x1f1   :  { %v1883_v6 = vadd.f32 %v1882_v15, %v1881_v35  ;;  %v1567_v43 = vcombine.high %v1539_v0, %v1539_v0  ;;  %v1574_v13 = vrot.slane %v1539_v0, %v4963_v51  ;;  %v1566_v23 = vcombine.high %v1564_v62, %v1564_v62 }
 0x1f2   :  { %v2845_v20 = vadd.f32 %v2844_v8, %v2843_v58  ;;  %v1676_v31 = vsel %vm582_vm6, %v1557_v54, 0.0  ;;  %v1677_v17 = vsel %vm582_vm6, %v1565_v11, 0.0  ;;  %v1805_v4 = vcombine.high %v1729_v18, %v1729_v18 }
 0x1f3   :  { %v1885_v14 = vadd.f32 %v1884_v39, %v1883_v6  ;;  %v1886_v16 = vsel %vm582_vm6, %v1795_v45, 0.0  ;;  %v1678_v3 = vadd.f32 %v1677_v17, %v1676_v31  ;;  %v1804_v40 = vcombine.high %v1802_v50, %v1802_v50 }
 0x1f4   :  { %v2847_v33 = vadd.f32 %v2846_v61, %v2845_v20  ;;  %v1812_v44 = vrot.slane %v1729_v18, %v4963_v51  ;;  %v1679_v46 = vsel %vm582_vm6, %v1564_v62, 0.0  ;;  %v1888_v30 = vsel %vm582_vm6, %v1803_v21, 0.0 }
 0x1f5   :  { %v1887_v53 = vadd.f32 %v1886_v16, %v1885_v14  ;;  %v1540_v57 = vmul.f32 %v4251_v34, %v4251_v34  ;;  %v1680_v29 = vadd.f32 %v1679_v46, %v1678_v3  ;;  %v1581_v27 = vrot.slane %v1567_v43, %v4963_v51 }
 0x1f6   :  { %v2849_v47 = vadd.f32 %v2848_v32, %v2847_v33  ;;  %v1582_v63 = vcombine.high %v1574_v13, %v1574_v13  ;;  %v1681_v38 = vsel %vm582_vm6, %v1566_v23, 0.0  ;;  %v1890_v56 = vsel %vm582_vm6, %v1802_v50, 0.0 }
 0x1f7   :  { %v1889_v55 = vadd.f32 %v1888_v30, %v1887_v53  ;;  %v1682_v49 = vadd.f32 %v1681_v38, %v1680_v29  ;;  %v1730_v42 = vmul.f32 %v4212_v10, %v4212_v10  ;;  %v1819_v48 = vrot.slane %v1805_v4, %v4963_v51 }
 0x1f8   :  { %2850 = vadd.xlane.f32.xlu1 %v2849_v47  ;;  %v1683_v1 = vsel %vm582_vm6, %v1574_v13, 0.0  ;;  %v1820_v34 = vcombine.high %v1812_v44, %v1812_v44  ;;  %v1892_v25 = vsel %vm582_vm6, %v1804_v40, 0.0  ;;  %v1584_v41 = vcombine.high %v1540_v57, %v1540_v57 }
 0x1f9   :  { %v1891_v5 = vadd.f32 %v1890_v56, %v1889_v55  ;;  %v1684_v36 = vadd.f32 %v1683_v1, %v1682_v49  ;;  %v1583_v59 = vcombine.high %v1581_v27, %v1581_v27  ;;  %v1591_v37 = vrot.slane %v1540_v57, %v4963_v51 }
 0x1fa   :  { %v1685_v9 = vsel %vm582_vm6, %v1582_v63, 0.0  ;;  %v1894_v22 = vsel %vm582_vm6, %v1812_v44, 0.0  ;;  %v1822_v10 = vcombine.high %v1730_v42, %v1730_v42  ;;  %v1829_v60 = vrot.slane %v1730_v42, %v4963_v51 }
 0x1fb   :  { %v1893_v54 = vadd.f32 %v1892_v25, %v1891_v5  ;;  %v1686_v2 = vadd.f32 %v1685_v9, %v1684_v36  ;;  %v1687_v26 = vsel %vm582_vm6, %v1581_v27, 0.0  ;;  %v1821_v52 = vcombine.high %v1819_v48, %v1819_v48 }
 0x1fc   :  { %v1896_v28 = vsel %vm582_vm6, %v1820_v34, 0.0  ;;  %v1541_v7 = vmul.f32 %v4268_v19, %v4268_v19  ;;  %v1598_v35 = vrot.slane %v1584_v41, %v4963_v51  ;;  %v1599_v62 = vcombine.high %v1591_v37, %v1591_v37 }
 0x1fd   :  { %v1895_v45 = vadd.f32 %v1894_v22, %v1893_v54  ;;  %v1688_v0 = vadd.f32 %v1687_v26, %v1686_v2  ;;  %v1689_v11 = vsel %vm582_vm6, %v1583_v59, 0.0  ;;  %v1898_v58 = vsel %vm582_vm6, %v1819_v48, 0.0 }
 0x1fe   :  { %v1836_v18 = vrot.slane %v1822_v10, %v4963_v51  ;;  %v1691_v32 = vsel %vm582_vm6, %v1591_v37, 0.0  ;;  %v1837_v50 = vcombine.high %v1829_v60, %v1829_v60  ;;  %v1900_v21 = vsel %vm582_vm6, %v1821_v52, 0.0 }
 0x1ff   :  { %v1897_v8 = vadd.f32 %v1896_v28, %v1895_v45  ;;  %v1690_v61 = vadd.f32 %v1689_v11, %v1688_v0  ;;  %v1601_v6 = vcombine.high %v1541_v7, %v1541_v7  ;;  %v1600_v39 = vcombine.high %v1598_v35, %v1598_v35 }
 0x200   :  { %v1608_v43 = vrot.slane %v1541_v7, %v4963_v51  ;;  %v1693_v13 = vsel %vm582_vm6, %v1599_v62, 0.0  ;;  %v1902_v14 = vsel %vm582_vm6, %v1829_v60, 0.0  ;;  %v1695_v17 = vsel %vm582_vm6, %v1598_v35, 0.0 }
 0x201   :  { %v1899_v15 = vadd.f32 %v1898_v58, %v1897_v8  ;;  %v1692_v19 = vadd.f32 %v1691_v32, %v1690_v61  ;;  %v1838_v33 = vcombine.high %v1836_v18, %v1836_v18  ;;  %v1904_v4 = vsel %vm582_vm6, %v1837_v50, 0.0 }
 0x202   :  { %v1542_v16 = vmul.f32 %v4294_v24, %v4294_v24  ;;  %v1615_v44 = vrot.slane %v1601_v6, %v4963_v51  ;;  %v1616_v53 = vcombine.high %v1608_v43, %v1608_v43  ;;  %v1697_v46 = vsel %vm582_vm6, %v1600_v39, 0.0 }
 0x203   :  { %v1901_v20 = vadd.f32 %v1900_v21, %v1899_v15  ;;  %v1694_v23 = vadd.f32 %v1693_v13, %v1692_v19  ;;  %v1906_v47 = vsel %vm582_vm6, %v1836_v18, 0.0  ;;  %v1699_v29 = vsel %vm582_vm6, %v1608_v43, 0.0 }
 0x204   :  { %v1908_v55 = vsel %vm582_vm6, %v1838_v33, 0.0  ;;  %v1618_v27 = vcombine.high %v1542_v16, %v1542_v16  ;;  %v1617_v56 = vcombine.high %v1615_v44, %v1615_v44  ;;  %v1625_v24 = vrot.slane %v1542_v16, %v4963_v51 }
 0x205   :  { %v1903_v31 = vadd.f32 %v1902_v14, %v1901_v20  ;;  %v1696_v3 = vadd.f32 %v1695_v17, %v1694_v23  ;;  %v1701_v49 = vsel %vm582_vm6, %v1616_v53, 0.0  ;;  %v1703_v48 = vsel %vm582_vm6, %v1615_v44, 0.0 }
 0x206   :  { %v1543_v1 = vmul.f32 %v4303_v12, %v4303_v12  ;;  %v1632_v34 = vrot.slane %v1618_v27, %v4963_v51  ;;  %v1633_v25 = vcombine.high %v1625_v24, %v1625_v24  ;;  %v1705_v41 = vsel %vm582_vm6, %v1617_v56, 0.0 }
 0x207   :  { %v1905_v40 = vadd.f32 %v1904_v4, %v1903_v31  ;;  %v1698_v30 = vadd.f32 %v1697_v46, %v1696_v3  ;;  %v1707_v54 = vsel %vm582_vm6, %v1625_v24, 0.0 }
 0x208   :  { %v1634_v37 = vcombine.high %v1632_v34, %v1632_v34  ;;  %v1635_v9 = vcombine.high %v1543_v1, %v1543_v1  ;;  %v1642_v22 = vrot.slane %v1543_v1, %v4963_v51  ;;  %v1709_v2 = vsel %vm582_vm6, %v1633_v25, 0.0 }
 0x209   :  { %v1907_v57 = vadd.f32 %v1906_v47, %v1905_v40  ;;  %v1700_v63 = vadd.f32 %v1699_v29, %v1698_v30  ;;  %v1711_v60 = vsel %vm582_vm6, %v1632_v34, 0.0 }
 0x20a   :  { %v1649_v12 = vrot.slane %v1635_v9, %v4963_v51  ;;  %v1650_v26 = vcombine.high %v1642_v22, %v1642_v22  ;;  %v1713_v52 = vsel %vm582_vm6, %v1634_v37, 0.0  ;;  %v1715_v7 = vsel %vm582_vm6, %v1642_v22, 0.0 }
 0x20b   :  { %v1909_v38 = vadd.f32 %v1908_v55, %v1907_v57  ;;  %v1702_v42 = vadd.f32 %v1701_v49, %v1700_v63 }
 0x20c   :  { %v1651_v8 = vcombine.high %v1649_v12, %v1649_v12  ;;  %v1717_v35 = vsel %vm582_vm6, %v1650_v26, 0.0  ;;  %v1719_v11 = vsel %vm582_vm6, %v1649_v12, 0.0 }
 0x20d   :  { %1910 = vadd.xlane.f32.xlu0 %v1909_v38  ;;  %v1704_v5 = vadd.f32 %v1703_v48, %v1702_v42 }
 0x20e   :  { %v1721_v61 = vsel %vm582_vm6, %v1651_v8, 0.0 }
 0x20f   :  { %v1706_v36 = vadd.f32 %v1705_v41, %v1704_v5 }
 0x211   :  { %v1708_v59 = vadd.f32 %v1707_v54, %v1706_v36 }
 0x213   :  { %v1710_v10 = vadd.f32 %v1709_v2, %v1708_v59 }
 0x215   :  { %v1712_v45 = vadd.f32 %v1711_v60, %v1710_v10 }
 0x217   :  { %v1714_v28 = vadd.f32 %v1713_v52, %v1712_v45 }
 0x219   :  { %v1716_v0 = vadd.f32 %v1715_v7, %v1714_v28 }
 0x21b   :  { %v1718_v62 = vadd.f32 %v1717_v35, %v1716_v0 }
 0x21d   :  { %v1720_v58 = vadd.f32 %v1719_v11, %v1718_v62 }
 0x21f   :  { %v1722_v18 = vadd.f32 %v1721_v61, %v1720_v58 }
 0x221   :  { %1723 = vadd.xlane.f32.xlu1 %v1722_v18 }
 0x224   :  { %v2286_v15 = vpop.xlane.xlu0 %2285 }
 0x234   :  { %v2099_v51 = vpop.xlane.xlu1 %2098 }
 0x235   :  { %v2287_v20 = vmul.f32 %v2286_v15, %v2099_v51 }
 0x249   :  { %v2662_v32 = vpop.xlane.xlu0 %2661 }
 0x25c   :  { %v2475_v50 = vpop.xlane.xlu1 %2474 }
 0x25d   :  { %v2663_v19 = vmul.f32 %v2662_v32, %v2475_v50 }
 0x25f   :  { %v2664_v43 = vadd.f32 %v2663_v19, %v2287_v20 }
 0x270   :  { %v3038_v21 = vpop.xlane.xlu0 %3037 }
 0x285   :  { %v2851_v6 = vpop.xlane.xlu1 %2850 }
 0x286   :  { %v3039_v39 = vmul.f32 %v3038_v21, %v2851_v6 }
 0x288   :  { %v3040_v14 = vadd.f32 %v3039_v39, %v2664_v43 }
 0x28a   :  { %v3042_v33 = vmul.f32 2.0, %v3040_v14 }
 0x29a   :  { %v1911_v13 = vpop.xlane.xlu0 %1910 }
 0x2ae   :  { %v1724_v23 = vpop.xlane.xlu1 %1723 }
 0x2af   :  { %v1912_v31 = vadd.f32 %v1911_v13, %v1724_v23 }
 0x2b1   :  { %v3041_v17 = vmul.f32 1024.0, %v1912_v31 }
 0x2b3   :  { %v3043_v4 = vsub.f32 %v3041_v17, %v3042_v33 }
 0x2b5   :  { %3044 = vst [vmem:[%s4628_s2] sm:$0x3] %v3043_v4 }

</bundles_post_ra>
